<compile_context>
chip_gen: v6e
topology: v6e:2x2x1
jax: 0.10.0
libtpu: 0.0.40
codegen_flags: <defaults>
</compile_context>

<pallas_src>
import math

import jax
import jax.numpy as jnp
from jax.experimental import pallas as pl
from jax.experimental.pallas import tpu as pltpu


# ----------------------------------------------------------------------------
# Pallas kernels
# ----------------------------------------------------------------------------
def _conv_relu_pool_kernel(p_ref, w_ref, b_ref, o_ref):
    """Fused conv (im2col matmul) + bias + ReLU + 2x2 max-pool for one sample.

    p_ref : (1, 4, M, K)  -- 4 pool-offset patch matrices, stacked
    w_ref : (K, C)        -- conv weight, rows in (kh, kw, cin) order
    b_ref : (1, C)
    o_ref : (1, M, C)     -- pooled, channels-last rows (ph, pw)
    Pool = running max over the 4 offsets (ReLU is monotone, so
    max(relu(.)) == relu-then-maxpool).
    """
    w = w_ref[...]
    b = b_ref[...]

    y = jnp.maximum(
        jnp.dot(p_ref[0, 0], w, preferred_element_type=jnp.float32) + b, 0.0)
    for t in range(1, 4):
        yt = jnp.maximum(
            jnp.dot(p_ref[0, t], w, preferred_element_type=jnp.float32) + b, 0.0)
        y = jnp.maximum(y, yt)

    o_ref[0] = y.astype(o_ref.dtype)


def _fc_stack_kernel(x_ref, w1_ref, b1_ref, w2_ref, b2_ref, w3_ref, b3_ref,
                     o_ref):
    """Fused fc1(ReLU) -> fc2(ReLU) -> fc3; intermediates stay in vregs."""
    h = jnp.dot(x_ref[...], w1_ref[...], preferred_element_type=jnp.float32)
    h = jnp.maximum(h + b1_ref[...], 0.0)
    h = jnp.dot(h, w2_ref[...], preferred_element_type=jnp.float32)
    h = jnp.maximum(h + b2_ref[...], 0.0)
    o = jnp.dot(h, w3_ref[...], preferred_element_type=jnp.float32) + b3_ref[...]
    o_ref[...] = o.astype(o_ref.dtype)


# ----------------------------------------------------------------------------
# pallas_call wrappers
# ----------------------------------------------------------------------------
def _full_spec(shape):
    """Full-array block (exempt from (8,128) divisibility), constant index."""
    zeros = (0,) * len(shape)
    return pl.BlockSpec(shape, lambda i, _z=zeros: _z)


def conv_relu_pool(patches, w_mat, b_row):
    """patches: (N, 4, M, K); w_mat: (K, C); b_row: (1, C) -> (N, M, C)."""
    N, _, M, K = patches.shape
    C = w_mat.shape[1]
    return pl.pallas_call(
        _conv_relu_pool_kernel,
        out_shape=jax.ShapeDtypeStruct((N, M, C), jnp.float32),
        grid=(N,),
        in_specs=[
            pl.BlockSpec((1, 4, M, K), lambda n: (n, 0, 0, 0)),
            pl.BlockSpec((K, C), lambda n: (0, 0)),
            pl.BlockSpec((1, C), lambda n: (0, 0)),
        ],
        out_specs=pl.BlockSpec((1, M, C), lambda n: (n, 0, 0)),
        compiler_params=pltpu.CompilerParams(
            dimension_semantics=("parallel",)),   # uses both TCs on v7x
    )(patches, w_mat, b_row)


def fc_stack(x, p):
    """Fused 3-layer MLP head.  x: (N, 400) -> (N, 10)."""
    N = x.shape[0]
    ins = (x, p["fc1_w"], p["fc1_b"], p["fc2_w"], p["fc2_b"],
           p["fc3_w"], p["fc3_b"])
    return pl.pallas_call(
        _fc_stack_kernel,
        out_shape=jax.ShapeDtypeStruct((N, 10), jnp.float32),
        grid=(1,),
        in_specs=[_full_spec(a.shape) for a in ins],
        out_specs=_full_spec((N, 10)),
    )(*ins)


# ----------------------------------------------------------------------------
# Glue: pooled im2col patch extraction, channels-last, few XLA ops
# ----------------------------------------------------------------------------
def _conv_pool_patches(x_nhwc, ksize):
    """x: (N, H, W, C) channels-last.

    Returns (patches, (PH, PW)) with patches of shape
    (N, 4, PH*PW, ksize*ksize*C); feature (column) order is (kh, kw, cin),
    pool offsets ordered ((0,0),(0,1),(1,0),(1,1)); rows ordered (ph, pw).
    """
    N, H, W, C = x_nhwc.shape
    OH, OW = H - ksize + 1, W - ksize + 1
    PH, PW = OH // 2, OW // 2

    # All k*k shifted views at stride 1, stacked -> (N, OH, OW, K2, C).
    shifted = jnp.stack(
        [x_nhwc[:, ki:ki + OH, kj:kj + OW, :]
         for ki in range(ksize) for kj in range(ksize)],
        axis=3)

    # The 4 pool-offset strided views -> (N, 4, PH, PW, K2, C).
    offs = []
    for di in (0, 1):
        for dj in (0, 1):
            offs.append(shifted[:, di:di + 2 * PH:2, dj:dj + 2 * PW:2])
    p = jnp.stack(offs, axis=1)

    return p.reshape(N, 4, PH * PW, ksize * ksize * C), (PH, PW)


# ----------------------------------------------------------------------------
# Parameter prep (done ONCE, outside the forward path)
# ----------------------------------------------------------------------------
def prepare_params(params):
    def conv_w(w):  # OIHW -> rows (kh, kw, cin), cols cout
        return jnp.transpose(w, (2, 3, 1, 0)).reshape(-1, w.shape[0])

    # torch.flatten(NCHW) feeds fc1 in (c, h, w) order; our activations are
    # flattened in (h, w, c) order, so permute fc1's input rows once here.
    fc1 = params["fc1_w"].reshape(120, 16, 5, 5)          # (out, c, h, w)
    fc1 = jnp.transpose(fc1, (2, 3, 1, 0)).reshape(400, 120)  # rows (h, w, c)

    return {
        "conv1_w": conv_w(params["conv1_w"]),             # (25, 6)
        "conv1_b": params["conv1_b"].reshape(1, 6),
        "conv2_w": conv_w(params["conv2_w"]),             # (150, 16)
        "conv2_b": params["conv2_b"].reshape(1, 16),
        "fc1_w": fc1,                                     # (400, 120)
        "fc1_b": params["fc1_b"].reshape(1, 120),
        "fc2_w": params["fc2_w"].T,                       # (120, 84)
        "fc2_b": params["fc2_b"].reshape(1, 84),
        "fc3_w": params["fc3_w"].T,                       # (84, 10)
        "fc3_b": params["fc3_b"].reshape(1, 10),
    }


# ----------------------------------------------------------------------------
# Full network forward (3 pallas_calls, channels-last throughout)
# ----------------------------------------------------------------------------
def net_forward(x_nchw, p):
    N = x_nchw.shape[0]
    x = jnp.transpose(x_nchw, (0, 2, 3, 1))               # NHWC (N,32,32,1)

    # conv1 (1->6, k=5) + ReLU + 2x2 maxpool
    pat1, (PH1, PW1) = _conv_pool_patches(x, 5)           # (N,4,196,25)
    y1 = conv_relu_pool(pat1, p["conv1_w"], p["conv1_b"]) # (N,196,6)
    y1 = y1.reshape(N, PH1, PW1, 6)                       # NHWC, contiguous reshape

    # conv2 (6->16, k=5) + ReLU + 2x2 maxpool
    pat2, (PH2, PW2) = _conv_pool_patches(y1, 5)          # (N,4,25,150)
    y2 = conv_relu_pool(pat2, p["conv2_w"], p["conv2_b"]) # (N,25,16)
    feat = y2.reshape(N, PH2 * PW2 * 16)                  # (N,400), (h,w,c) order

    # fused fc1 -> fc2 -> fc3
    return fc_stack(feat, p)


# ----------------------------------------------------------------------------
# Pure-JAX reference (high precision) for a correctness check
# ----------------------------------------------------------------------------
def net_reference(x, params):
    hp = jax.lax.Precision.HIGHEST

    def conv2d(inp, w, b):
        y = jax.lax.conv_general_dilated(
            inp, w, (1, 1), "VALID",
            dimension_numbers=("NCHW", "OIHW", "NCHW"), precision=hp)
        return y + b.reshape(1, -1, 1, 1)

    def pool(y):
        return jax.lax.reduce_window(y, -jnp.inf, jax.lax.max,
                                     (1, 1, 2, 2), (1, 1, 2, 2), "VALID")

    y = pool(jnp.maximum(conv2d(x, params["conv1_w"], params["conv1_b"]), 0.0))
    y = pool(jnp.maximum(conv2d(y, params["conv2_w"], params["conv2_b"]), 0.0))
    y = y.reshape(y.shape[0], -1)
    y = jnp.maximum(jnp.dot(y, params["fc1_w"].T, precision=hp) + params["fc1_b"], 0.0)
    y = jnp.maximum(jnp.dot(y, params["fc2_w"].T, precision=hp) + params["fc2_b"], 0.0)
    return jnp.dot(y, params["fc3_w"].T, precision=hp) + params["fc3_b"]


# ----------------------------------------------------------------------------
# Parameter init (deterministic, PyTorch-style uniform(-1/sqrt(fan_in)))
# ----------------------------------------------------------------------------
def init_params(key):
    ks = jax.random.split(key, 10)

    def u(k, shape, fan_in):
        bound = 1.0 / math.sqrt(fan_in)
        return jax.random.uniform(k, shape, jnp.float32, -bound, bound)

    return {
        "conv1_w": u(ks[0], (6, 1, 5, 5), 1 * 5 * 5),
        "conv1_b": u(ks[1], (6,), 1 * 5 * 5),
        "conv2_w": u(ks[2], (16, 6, 5, 5), 6 * 5 * 5),
        "conv2_b": u(ks[3], (16,), 6 * 5 * 5),
        "fc1_w":   u(ks[4], (120, 400), 400),
        "fc1_b":   u(ks[5], (120,), 400),
        "fc2_w":   u(ks[6], (84, 120), 120),
        "fc2_b":   u(ks[7], (84,), 120),
        "fc3_w":   u(ks[8], (10, 84), 84),
        "fc3_b":   u(ks[9], (10,), 84),
    }


if __name__ == "__main__":
    key = jax.random.PRNGKey(0)
    pkey, xkey = jax.random.split(key)
    params = init_params(pkey)
    prepped = prepare_params(params)          # one-time weight layout prep

    # LeNet geometry requires 1x32x32 input (so flatten gives 16*5*5 = 400).
    x = jax.random.normal(xkey, (2, 1, 32, 32), dtype=jnp.float32)

    fwd = jax.jit(net_forward)
    out = jax.block_until_ready(fwd(x, prepped))

    assert out.shape == (2, 10), out.shape
    assert out.dtype == jnp.float32

    ref = jax.block_until_ready(jax.jit(net_reference)(x, params))
    assert jnp.allclose(out, ref, rtol=5e-3, atol=5e-3), (out, ref)

    print("KERNEL_OK")
</pallas_src>

<mosaic_0001>
module attributes {stable_mosaic.version = 11 : i64} {
  func.func @_conv_relu_pool_kernel(%arg0: i32, %arg1: memref<1x4x196x25xf32, #tpu.memory_space<vmem>>, %arg2: memref<25x6xf32, #tpu.memory_space<vmem>>, %arg3: memref<1x6xf32, #tpu.memory_space<vmem>>, %arg4: memref<1x196x6xf32, #tpu.memory_space<vmem>>) attributes {dimension_semantics = [#tpu.dimension_semantics<parallel>], iteration_bounds = array<i64: 2>, scalar_prefetch = 0 : i64, scratch_operands = 0 : i64, tpu.core_type = #tpu.core_type<tc>, window_params = [{transform_indices = @transform_0, window_bounds = array<i64: 1, 4, 196, 25>}, {pipeline_mode = #tpu.pipeline_mode<synchronous>, transform_indices = @transform_1, window_bounds = array<i64: 25, 6>}, {pipeline_mode = #tpu.pipeline_mode<synchronous>, transform_indices = @transform_2, window_bounds = array<i64: 1, 6>}, {transform_indices = @transform_3, window_bounds = array<i64: 1, 196, 6>}]} {
    %c0 = arith.constant 0 : index
    %c0_0 = arith.constant 0 : index
    %0 = vector.load %arg2[%c0, %c0_0] : memref<25x6xf32, #tpu.memory_space<vmem>>, vector<25x6xf32>
    %c0_1 = arith.constant 0 : index
    %c0_2 = arith.constant 0 : index
    %1 = vector.load %arg3[%c0_1, %c0_2] : memref<1x6xf32, #tpu.memory_space<vmem>>, vector<1x6xf32>
    %c0_3 = arith.constant 0 : index
    %c0_4 = arith.constant 0 : index
    %c0_5 = arith.constant 0 : index
    %c0_6 = arith.constant 0 : index
    %2 = vector.load %arg1[%c0_3, %c0_4, %c0_5, %c0_6] : memref<1x4x196x25xf32, #tpu.memory_space<vmem>>, vector<1x1x196x25xf32>
    %3 = vector.shape_cast %2 : vector<1x1x196x25xf32> to vector<196x25xf32>
    %cst = arith.constant dense<0.000000e+00> : vector<196x6xf32>
    %4 = tpu.matmul %3, %0, %cst {dimension_numbers = #tpu.dot_dimension_numbers<[1], [0], [0], [1], [0, 0, 1, 1], [], []>} : vector<196x25xf32>, vector<25x6xf32>, vector<196x6xf32> -> vector<196x6xf32>
    %5 = vector.broadcast %1 : vector<1x6xf32> to vector<196x6xf32>
    %6 = arith.addf %4, %5 : vector<196x6xf32>
    %cst_7 = arith.constant 0.000000e+00 : f32
    %7 = vector.broadcast %cst_7 : f32 to vector<196x6xf32>
    %8 = arith.maximumf %6, %7 : vector<196x6xf32>
    %c0_8 = arith.constant 0 : index
    %c1 = arith.constant 1 : index
    %c0_9 = arith.constant 0 : index
    %c0_10 = arith.constant 0 : index
    %9 = vector.load %arg1[%c0_8, %c1, %c0_9, %c0_10] : memref<1x4x196x25xf32, #tpu.memory_space<vmem>>, vector<1x1x196x25xf32>
    %10 = vector.shape_cast %9 : vector<1x1x196x25xf32> to vector<196x25xf32>
    %cst_11 = arith.constant dense<0.000000e+00> : vector<196x6xf32>
    %11 = tpu.matmul %10, %0, %cst_11 {dimension_numbers = #tpu.dot_dimension_numbers<[1], [0], [0], [1], [0, 0, 1, 1], [], []>} : vector<196x25xf32>, vector<25x6xf32>, vector<196x6xf32> -> vector<196x6xf32>
    %12 = vector.broadcast %1 : vector<1x6xf32> to vector<196x6xf32>
    %13 = arith.addf %11, %12 : vector<196x6xf32>
    %cst_12 = arith.constant 0.000000e+00 : f32
    %14 = vector.broadcast %cst_12 : f32 to vector<196x6xf32>
    %15 = arith.maximumf %13, %14 : vector<196x6xf32>
    %16 = arith.maximumf %8, %15 : vector<196x6xf32>
    %c0_13 = arith.constant 0 : index
    %c2 = arith.constant 2 : index
    %c0_14 = arith.constant 0 : index
    %c0_15 = arith.constant 0 : index
    %17 = vector.load %arg1[%c0_13, %c2, %c0_14, %c0_15] : memref<1x4x196x25xf32, #tpu.memory_space<vmem>>, vector<1x1x196x25xf32>
    %18 = vector.shape_cast %17 : vector<1x1x196x25xf32> to vector<196x25xf32>
    %cst_16 = arith.constant dense<0.000000e+00> : vector<196x6xf32>
    %19 = tpu.matmul %18, %0, %cst_16 {dimension_numbers = #tpu.dot_dimension_numbers<[1], [0], [0], [1], [0, 0, 1, 1], [], []>} : vector<196x25xf32>, vector<25x6xf32>, vector<196x6xf32> -> vector<196x6xf32>
    %20 = vector.broadcast %1 : vector<1x6xf32> to vector<196x6xf32>
    %21 = arith.addf %19, %20 : vector<196x6xf32>
    %cst_17 = arith.constant 0.000000e+00 : f32
    %22 = vector.broadcast %cst_17 : f32 to vector<196x6xf32>
    %23 = arith.maximumf %21, %22 : vector<196x6xf32>
    %24 = arith.maximumf %16, %23 : vector<196x6xf32>
    %c0_18 = arith.constant 0 : index
    %c3 = arith.constant 3 : index
    %c0_19 = arith.constant 0 : index
    %c0_20 = arith.constant 0 : index
    %25 = vector.load %arg1[%c0_18, %c3, %c0_19, %c0_20] : memref<1x4x196x25xf32, #tpu.memory_space<vmem>>, vector<1x1x196x25xf32>
    %26 = vector.shape_cast %25 : vector<1x1x196x25xf32> to vector<196x25xf32>
    %cst_21 = arith.constant dense<0.000000e+00> : vector<196x6xf32>
    %27 = tpu.matmul %26, %0, %cst_21 {dimension_numbers = #tpu.dot_dimension_numbers<[1], [0], [0], [1], [0, 0, 1, 1], [], []>} : vector<196x25xf32>, vector<25x6xf32>, vector<196x6xf32> -> vector<196x6xf32>
    %28 = vector.broadcast %1 : vector<1x6xf32> to vector<196x6xf32>
    %29 = arith.addf %27, %28 : vector<196x6xf32>
    %cst_22 = arith.constant 0.000000e+00 : f32
    %30 = vector.broadcast %cst_22 : f32 to vector<196x6xf32>
    %31 = arith.maximumf %29, %30 : vector<196x6xf32>
    %32 = arith.maximumf %24, %31 : vector<196x6xf32>
    %c0_23 = arith.constant 0 : index
    %c0_24 = arith.constant 0 : index
    %c0_25 = arith.constant 0 : index
    %33 = vector.load %arg4[%c0_23, %c0_24, %c0_25] : memref<1x196x6xf32, #tpu.memory_space<vmem>>, vector<1x196x6xf32>
    %34 = vector.shape_cast %33 : vector<1x196x6xf32> to vector<196x6xf32>
    %35 = vector.shape_cast %32 : vector<196x6xf32> to vector<1x196x6xf32>
    tpu.vector_store %arg4[%c0_23, %c0_24, %c0_25], %35 {strides = array<i32>} : memref<1x196x6xf32, #tpu.memory_space<vmem>>, vector<1x196x6xf32>,
    return
  }
  func.func @transform_0(%arg0: i32) -> (i32, i32, i32, i32) {
    %c0_i32 = arith.constant 0 : i32
    %c0_i32_0 = arith.constant 0 : i32
    %c0_i32_1 = arith.constant 0 : i32
    %c0_i32_2 = arith.constant 0 : i32
    return %arg0, %c0_i32, %c0_i32_0, %c0_i32_1 : i32, i32, i32, i32
  }
  func.func @transform_1(%arg0: i32) -> (i32, i32) {
    %c0_i32 = arith.constant 0 : i32
    %c0_i32_0 = arith.constant 0 : i32
    %c0_i32_1 = arith.constant 0 : i32
    return %c0_i32, %c0_i32_0 : i32, i32
  }
  func.func @transform_2(%arg0: i32) -> (i32, i32) {
    %c0_i32 = arith.constant 0 : i32
    %c0_i32_0 = arith.constant 0 : i32
    %c0_i32_1 = arith.constant 0 : i32
    return %c0_i32, %c0_i32_0 : i32, i32
  }
  func.func @transform_3(%arg0: i32) -> (i32, i32, i32) {
    %c0_i32 = arith.constant 0 : i32
    %c0_i32_0 = arith.constant 0 : i32
    %c0_i32_1 = arith.constant 0 : i32
    return %arg0, %c0_i32, %c0_i32_0 : i32, i32, i32
  }
}

module attributes {stable_mosaic.version = 11 : i64} {
  func.func @_conv_relu_pool_kernel(%arg0: i32, %arg1: memref<1x4x25x150xf32, #tpu.memory_space<vmem>>, %arg2: memref<150x16xf32, #tpu.memory_space<vmem>>, %arg3: memref<1x16xf32, #tpu.memory_space<vmem>>, %arg4: memref<1x25x16xf32, #tpu.memory_space<vmem>>) attributes {dimension_semantics = [#tpu.dimension_semantics<parallel>], iteration_bounds = array<i64: 2>, scalar_prefetch = 0 : i64, scratch_operands = 0 : i64, tpu.core_type = #tpu.core_type<tc>, window_params = [{transform_indices = @transform_0, window_bounds = array<i64: 1, 4, 25, 150>}, {pipeline_mode = #tpu.pipeline_mode<synchronous>, transform_indices = @transform_1, window_bounds = array<i64: 150, 16>}, {pipeline_mode = #tpu.pipeline_mode<synchronous>, transform_indices = @transform_2, window_bounds = array<i64: 1, 16>}, {transform_indices = @transform_3, window_bounds = array<i64: 1, 25, 16>}]} {
    %c0 = arith.constant 0 : index
    %c0_0 = arith.constant 0 : index
    %0 = vector.load %arg2[%c0, %c0_0] : memref<150x16xf32, #tpu.memory_space<vmem>>, vector<150x16xf32>
    %c0_1 = arith.constant 0 : index
    %c0_2 = arith.constant 0 : index
    %1 = vector.load %arg3[%c0_1, %c0_2] : memref<1x16xf32, #tpu.memory_space<vmem>>, vector<1x16xf32>
    %c0_3 = arith.constant 0 : index
    %c0_4 = arith.constant 0 : index
    %c0_5 = arith.constant 0 : index
    %c0_6 = arith.constant 0 : index
    %2 = vector.load %arg1[%c0_3, %c0_4, %c0_5, %c0_6] : memref<1x4x25x150xf32, #tpu.memory_space<vmem>>, vector<1x1x25x150xf32>
    %3 = vector.shape_cast %2 : vector<1x1x25x150xf32> to vector<25x150xf32>
    %cst = arith.constant dense<0.000000e+00> : vector<25x16xf32>
    %4 = tpu.matmul %3, %0, %cst {dimension_numbers = #tpu.dot_dimension_numbers<[1], [0], [0], [1], [0, 0, 1, 1], [], []>} : vector<25x150xf32>, vector<150x16xf32>, vector<25x16xf32> -> vector<25x16xf32>
    %5 = vector.broadcast %1 : vector<1x16xf32> to vector<25x16xf32>
    %6 = arith.addf %4, %5 : vector<25x16xf32>
    %cst_7 = arith.constant 0.000000e+00 : f32
    %7 = vector.broadcast %cst_7 : f32 to vector<25x16xf32>
    %8 = arith.maximumf %6, %7 : vector<25x16xf32>
    %c0_8 = arith.constant 0 : index
    %c1 = arith.constant 1 : index
    %c0_9 = arith.constant 0 : index
    %c0_10 = arith.constant 0 : index
    %9 = vector.load %arg1[%c0_8, %c1, %c0_9, %c0_10] : memref<1x4x25x150xf32, #tpu.memory_space<vmem>>, vector<1x1x25x150xf32>
    %10 = vector.shape_cast %9 : vector<1x1x25x150xf32> to vector<25x150xf32>
    %cst_11 = arith.constant dense<0.000000e+00> : vector<25x16xf32>
    %11 = tpu.matmul %10, %0, %cst_11 {dimension_numbers = #tpu.dot_dimension_numbers<[1], [0], [0], [1], [0, 0, 1, 1], [], []>} : vector<25x150xf32>, vector<150x16xf32>, vector<25x16xf32> -> vector<25x16xf32>
    %12 = vector.broadcast %1 : vector<1x16xf32> to vector<25x16xf32>
    %13 = arith.addf %11, %12 : vector<25x16xf32>
    %cst_12 = arith.constant 0.000000e+00 : f32
    %14 = vector.broadcast %cst_12 : f32 to vector<25x16xf32>
    %15 = arith.maximumf %13, %14 : vector<25x16xf32>
    %16 = arith.maximumf %8, %15 : vector<25x16xf32>
    %c0_13 = arith.constant 0 : index
    %c2 = arith.constant 2 : index
    %c0_14 = arith.constant 0 : index
    %c0_15 = arith.constant 0 : index
    %17 = vector.load %arg1[%c0_13, %c2, %c0_14, %c0_15] : memref<1x4x25x150xf32, #tpu.memory_space<vmem>>, vector<1x1x25x150xf32>
    %18 = vector.shape_cast %17 : vector<1x1x25x150xf32> to vector<25x150xf32>
    %cst_16 = arith.constant dense<0.000000e+00> : vector<25x16xf32>
    %19 = tpu.matmul %18, %0, %cst_16 {dimension_numbers = #tpu.dot_dimension_numbers<[1], [0], [0], [1], [0, 0, 1, 1], [], []>} : vector<25x150xf32>, vector<150x16xf32>, vector<25x16xf32> -> vector<25x16xf32>
    %20 = vector.broadcast %1 : vector<1x16xf32> to vector<25x16xf32>
    %21 = arith.addf %19, %20 : vector<25x16xf32>
    %cst_17 = arith.constant 0.000000e+00 : f32
    %22 = vector.broadcast %cst_17 : f32 to vector<25x16xf32>
    %23 = arith.maximumf %21, %22 : vector<25x16xf32>
    %24 = arith.maximumf %16, %23 : vector<25x16xf32>
    %c0_18 = arith.constant 0 : index
    %c3 = arith.constant 3 : index
    %c0_19 = arith.constant 0 : index
    %c0_20 = arith.constant 0 : index
    %25 = vector.load %arg1[%c0_18, %c3, %c0_19, %c0_20] : memref<1x4x25x150xf32, #tpu.memory_space<vmem>>, vector<1x1x25x150xf32>
    %26 = vector.shape_cast %25 : vector<1x1x25x150xf32> to vector<25x150xf32>
    %cst_21 = arith.constant dense<0.000000e+00> : vector<25x16xf32>
    %27 = tpu.matmul %26, %0, %cst_21 {dimension_numbers = #tpu.dot_dimension_numbers<[1], [0], [0], [1], [0, 0, 1, 1], [], []>} : vector<25x150xf32>, vector<150x16xf32>, vector<25x16xf32> -> vector<25x16xf32>
    %28 = vector.broadcast %1 : vector<1x16xf32> to vector<25x16xf32>
    %29 = arith.addf %27, %28 : vector<25x16xf32>
    %cst_22 = arith.constant 0.000000e+00 : f32
    %30 = vector.broadcast %cst_22 : f32 to vector<25x16xf32>
    %31 = arith.maximumf %29, %30 : vector<25x16xf32>
    %32 = arith.maximumf %24, %31 : vector<25x16xf32>
    %c0_23 = arith.constant 0 : index
    %c0_24 = arith.constant 0 : index
    %c0_25 = arith.constant 0 : index
    %33 = vector.load %arg4[%c0_23, %c0_24, %c0_25] : memref<1x25x16xf32, #tpu.memory_space<vmem>>, vector<1x25x16xf32>
    %34 = vector.shape_cast %33 : vector<1x25x16xf32> to vector<25x16xf32>
    %35 = vector.shape_cast %32 : vector<25x16xf32> to vector<1x25x16xf32>
    tpu.vector_store %arg4[%c0_23, %c0_24, %c0_25], %35 {strides = array<i32>} : memref<1x25x16xf32, #tpu.memory_space<vmem>>, vector<1x25x16xf32>,
    return
  }
  func.func @transform_0(%arg0: i32) -> (i32, i32, i32, i32) {
    %c0_i32 = arith.constant 0 : i32
    %c0_i32_0 = arith.constant 0 : i32
    %c0_i32_1 = arith.constant 0 : i32
    %c0_i32_2 = arith.constant 0 : i32
    return %arg0, %c0_i32, %c0_i32_0, %c0_i32_1 : i32, i32, i32, i32
  }
  func.func @transform_1(%arg0: i32) -> (i32, i32) {
    %c0_i32 = arith.constant 0 : i32
    %c0_i32_0 = arith.constant 0 : i32
    %c0_i32_1 = arith.constant 0 : i32
    return %c0_i32, %c0_i32_0 : i32, i32
  }
  func.func @transform_2(%arg0: i32) -> (i32, i32) {
    %c0_i32 = arith.constant 0 : i32
    %c0_i32_0 = arith.constant 0 : i32
    %c0_i32_1 = arith.constant 0 : i32
    return %c0_i32, %c0_i32_0 : i32, i32
  }
  func.func @transform_3(%arg0: i32) -> (i32, i32, i32) {
    %c0_i32 = arith.constant 0 : i32
    %c0_i32_0 = arith.constant 0 : i32
    %c0_i32_1 = arith.constant 0 : i32
    return %arg0, %c0_i32, %c0_i32_0 : i32, i32, i32
  }
}

module attributes {stable_mosaic.version = 11 : i64} {
  func.func @_fc_stack_kernel(%arg0: i32, %arg1: memref<2x400xf32, #tpu.memory_space<vmem>>, %arg2: memref<400x120xf32, #tpu.memory_space<vmem>>, %arg3: memref<1x120xf32, #tpu.memory_space<vmem>>, %arg4: memref<120x84xf32, #tpu.memory_space<vmem>>, %arg5: memref<1x84xf32, #tpu.memory_space<vmem>>, %arg6: memref<84x10xf32, #tpu.memory_space<vmem>>, %arg7: memref<1x10xf32, #tpu.memory_space<vmem>>, %arg8: memref<2x10xf32, #tpu.memory_space<vmem>>) attributes {dimension_semantics = [#tpu.dimension_semantics<arbitrary>], iteration_bounds = array<i64: 1>, scalar_prefetch = 0 : i64, scratch_operands = 0 : i64, tpu.core_type = #tpu.core_type<tc>, window_params = [{pipeline_mode = #tpu.pipeline_mode<synchronous>, transform_indices = @transform_0, window_bounds = array<i64: 2, 400>}, {pipeline_mode = #tpu.pipeline_mode<synchronous>, transform_indices = @transform_1, window_bounds = array<i64: 400, 120>}, {pipeline_mode = #tpu.pipeline_mode<synchronous>, transform_indices = @transform_2, window_bounds = array<i64: 1, 120>}, {pipeline_mode = #tpu.pipeline_mode<synchronous>, transform_indices = @transform_3, window_bounds = array<i64: 120, 84>}, {pipeline_mode = #tpu.pipeline_mode<synchronous>, transform_indices = @transform_4, window_bounds = array<i64: 1, 84>}, {pipeline_mode = #tpu.pipeline_mode<synchronous>, transform_indices = @transform_5, window_bounds = array<i64: 84, 10>}, {pipeline_mode = #tpu.pipeline_mode<synchronous>, transform_indices = @transform_6, window_bounds = array<i64: 1, 10>}, {pipeline_mode = #tpu.pipeline_mode<synchronous>, transform_indices = @transform_7, window_bounds = array<i64: 2, 10>}]} {
    %c0 = arith.constant 0 : index
    %c0_0 = arith.constant 0 : index
    %0 = vector.load %arg1[%c0, %c0_0] : memref<2x400xf32, #tpu.memory_space<vmem>>, vector<2x400xf32>
    %c0_1 = arith.constant 0 : index
    %c0_2 = arith.constant 0 : index
    %1 = vector.load %arg2[%c0_1, %c0_2] : memref<400x120xf32, #tpu.memory_space<vmem>>, vector<400x120xf32>
    %cst = arith.constant dense<0.000000e+00> : vector<2x120xf32>
    %2 = tpu.matmul %0, %1, %cst {dimension_numbers = #tpu.dot_dimension_numbers<[1], [0], [0], [1], [0, 0, 1, 1], [], []>} : vector<2x400xf32>, vector<400x120xf32>, vector<2x120xf32> -> vector<2x120xf32>
    %c0_3 = arith.constant 0 : index
    %c0_4 = arith.constant 0 : index
    %3 = vector.load %arg3[%c0_3, %c0_4] : memref<1x120xf32, #tpu.memory_space<vmem>>, vector<1x120xf32>
    %4 = vector.broadcast %3 : vector<1x120xf32> to vector<2x120xf32>
    %5 = arith.addf %2, %4 : vector<2x120xf32>
    %cst_5 = arith.constant 0.000000e+00 : f32
    %6 = vector.broadcast %cst_5 : f32 to vector<2x120xf32>
    %7 = arith.maximumf %5, %6 : vector<2x120xf32>
    %c0_6 = arith.constant 0 : index
    %c0_7 = arith.constant 0 : index
    %8 = vector.load %arg4[%c0_6, %c0_7] : memref<120x84xf32, #tpu.memory_space<vmem>>, vector<120x84xf32>
    %cst_8 = arith.constant dense<0.000000e+00> : vector<2x84xf32>
    %9 = tpu.matmul %7, %8, %cst_8 {dimension_numbers = #tpu.dot_dimension_numbers<[1], [0], [0], [1], [0, 0, 1, 1], [], []>} : vector<2x120xf32>, vector<120x84xf32>, vector<2x84xf32> -> vector<2x84xf32>
    %c0_9 = arith.constant 0 : index
    %c0_10 = arith.constant 0 : index
    %10 = vector.load %arg5[%c0_9, %c0_10] : memref<1x84xf32, #tpu.memory_space<vmem>>, vector<1x84xf32>
    %11 = vector.broadcast %10 : vector<1x84xf32> to vector<2x84xf32>
    %12 = arith.addf %9, %11 : vector<2x84xf32>
    %cst_11 = arith.constant 0.000000e+00 : f32
    %13 = vector.broadcast %cst_11 : f32 to vector<2x84xf32>
    %14 = arith.maximumf %12, %13 : vector<2x84xf32>
    %c0_12 = arith.constant 0 : index
    %c0_13 = arith.constant 0 : index
    %15 = vector.load %arg6[%c0_12, %c0_13] : memref<84x10xf32, #tpu.memory_space<vmem>>, vector<84x10xf32>
    %cst_14 = arith.constant dense<0.000000e+00> : vector<2x10xf32>
    %16 = tpu.matmul %14, %15, %cst_14 {dimension_numbers = #tpu.dot_dimension_numbers<[1], [0], [0], [1], [0, 0, 1, 1], [], []>} : vector<2x84xf32>, vector<84x10xf32>, vector<2x10xf32> -> vector<2x10xf32>
    %c0_15 = arith.constant 0 : index
    %c0_16 = arith.constant 0 : index
    %17 = vector.load %arg7[%c0_15, %c0_16] : memref<1x10xf32, #tpu.memory_space<vmem>>, vector<1x10xf32>
    %18 = vector.broadcast %17 : vector<1x10xf32> to vector<2x10xf32>
    %19 = arith.addf %16, %18 : vector<2x10xf32>
    %c0_17 = arith.constant 0 : index
    %c0_18 = arith.constant 0 : index
    %20 = vector.load %arg8[%c0_17, %c0_18] : memref<2x10xf32, #tpu.memory_space<vmem>>, vector<2x10xf32>
    tpu.vector_store %arg8[%c0_17, %c0_18], %19 {strides = array<i32>} : memref<2x10xf32, #tpu.memory_space<vmem>>, vector<2x10xf32>,
    return
  }
  func.func @transform_0(%arg0: i32) -> (i32, i32) {
    %c0_i32 = arith.constant 0 : i32
    %c0_i32_0 = arith.constant 0 : i32
    %c0_i32_1 = arith.constant 0 : i32
    return %c0_i32, %c0_i32_0 : i32, i32
  }
  func.func @transform_1(%arg0: i32) -> (i32, i32) {
    %c0_i32 = arith.constant 0 : i32
    %c0_i32_0 = arith.constant 0 : i32
    %c0_i32_1 = arith.constant 0 : i32
    return %c0_i32, %c0_i32_0 : i32, i32
  }
  func.func @transform_2(%arg0: i32) -> (i32, i32) {
    %c0_i32 = arith.constant 0 : i32
    %c0_i32_0 = arith.constant 0 : i32
    %c0_i32_1 = arith.constant 0 : i32
    return %c0_i32, %c0_i32_0 : i32, i32
  }
  func.func @transform_3(%arg0: i32) -> (i32, i32) {
    %c0_i32 = arith.constant 0 : i32
    %c0_i32_0 = arith.constant 0 : i32
    %c0_i32_1 = arith.constant 0 : i32
    return %c0_i32, %c0_i32_0 : i32, i32
  }
  func.func @transform_4(%arg0: i32) -> (i32, i32) {
    %c0_i32 = arith.constant 0 : i32
    %c0_i32_0 = arith.constant 0 : i32
    %c0_i32_1 = arith.constant 0 : i32
    return %c0_i32, %c0_i32_0 : i32, i32
  }
  func.func @transform_5(%arg0: i32) -> (i32, i32) {
    %c0_i32 = arith.constant 0 : i32
    %c0_i32_0 = arith.constant 0 : i32
    %c0_i32_1 = arith.constant 0 : i32
    return %c0_i32, %c0_i32_0 : i32, i32
  }
  func.func @transform_6(%arg0: i32) -> (i32, i32) {
    %c0_i32 = arith.constant 0 : i32
    %c0_i32_0 = arith.constant 0 : i32
    %c0_i32_1 = arith.constant 0 : i32
    return %c0_i32, %c0_i32_0 : i32, i32
  }
  func.func @transform_7(%arg0: i32) -> (i32, i32) {
    %c0_i32 = arith.constant 0 : i32
    %c0_i32_0 = arith.constant 0 : i32
    %c0_i32_1 = arith.constant 0 : i32
    return %c0_i32, %c0_i32_0 : i32, i32
  }
}

</mosaic_0001>

<bundles_post_ra>
// kernel: net_forward.3
= control target key start
LH: loop header
LB: loop body
LE: loop exit
PB: predicated region body
PF: predicated region fallthrough
CT: control target
= control target key end

     0   :  { %s2286_s12 = smov 0   ;;  %s2972_s0 = inlined_call_operand.vmem [shape: f32[2,4,196,25], index: 0, kind: input, shape index: {}]   ;;  %s2973_s1 = inlined_call_operand.vmem [shape: f32[25,6], index: 1, kind: input, shape index: {}]   ;;  %s2974_s2 = inlined_call_operand.vmem [shape: f32[1,6], index: 2, kind: input, shape index: {}]   ;;  %s2975_s3 = inlined_call_operand.vmem [shape: f32[2,196,6], index: 3, kind: output, shape index: {}]  }
   0x1 LB: > { %s1607_s13 = sadd.s32 4294967295, %s2262_s12   ;;  %p1611_p0 = scmp.ge.s32.totalorder %s2262_s12, 1  ;;  %s2262_s12 = sphi %s2286_s12, %s13_s12  }
   0x2   : > { %p137_p1 = scmp.lt.s32.totalorder %s2262_s12, 3 }
   0x4   : > { %p138_p2 = pnand %p1611_p0, %p137_p1 }
   0x5   : > { %p161_p3 = scmp.lt.s32.totalorder (!%p138_p2), %s1607_s13, 1 }
   0x6   : > { %141 = sbr.rel (%p138_p2) target bundleno = 418 (0x1a2), region = 32 }
   0xb   : > { %v174_v0 = vld [vmem:[%s2973_s1 + $0x18] sm:$0x1]  ;;  %vm283_vm0 = vcmask 1040384   ;;  %v2264_v1 = vmov 0.0   ;;  %v173_v2 = vld [vmem:[%s2973_s1 + $0x10] sm:$0xff]  ;;  %v172_v3 = vld [vmem:[%s2973_s1 + $0x8] sm:$0xff] }
   0xc   : > { %1912 = vmatprep.subr.mxu0 %v2264_v1  ;;  %1995 = vmatprep.subr.mxu1 %v2264_v1  ;;  %s2977_s13 = smov (!%p161_p3, %s1607_s13), 1  ;;  %v171_v4 = vld [vmem:[%s2973_s1] sm:$0xff]  ;;  %vm207_vm1 = vcmask 203776   ;;  %vm2265_vm2 = vmmov 0   ;;  %vm1525_vm3 = vcmask 48128   ;;  %vm1550_vm4 = vcmask 44032  }
   0xd   : > { %1913 = vmatpush3.msk.msra.mxu0 %vm283_vm0, %v174_v0  ;;  %1996 = vmatpush3.msk.msra.mxu1 %vm283_vm0, %v174_v0  ;;  %s2244_s22 = smul.u32 800, %s2977_s13 }
   0xe   : > { %1914 = vmatprep.subr.mxu0 %v2264_v1  ;;  %1997 = vmatprep.subr.mxu1 %v2264_v1  ;;  %s2245_s28 = smul.u32 200, %s2977_s13 }
   0xf   : > { %1915 = vmatpush3.msra.mxu0 %v173_v2  ;;  %1998 = vmatpush3.msra.mxu1 %v173_v2  ;;  %s2323_s25 = scalar_lea.vmem %s2972_s0, %s2244_s22 }
  0x10   : > { %1916 = vmatprep.subr.mxu0 %v2264_v1  ;;  %1999 = vmatprep.subr.mxu1 %v2264_v1  ;;  %v176_v5 = vld [vmem:[%s2323_s25] sm:$0xff]  ;;  %v1641_v6 = vld [vmem:[%s2323_s25 + $0xc8] sm:$0xff]  ;;  %v1642_v8 = vld [vmem:[%s2323_s25 + $0xd0] sm:$0xff]  ;;  %s2847_s4 = scalar_lea.vmem %s2975_s3, %s2245_s28 }
  0x11   : > { %1917 = vmatpush3.msra.mxu0 %v172_v3  ;;  %2000 = vmatpush3.msra.mxu1 %v172_v3  ;;  %v177_v7 = vld [vmem:[%s2323_s25 + $0x8] sm:$0xff]  ;;  %v178_v9 = vld [vmem:[%s2323_s25 + $0x10] sm:$0xff]  ;;  %v1643_v10 = vld [vmem:[%s2323_s25 + $0xd8] sm:$0xff] }
  0x12   : > { %1918 = vmatprep.subr.mxu0 %v2264_v1  ;;  %1920 = vmatprep.mubr.msk.f32.mxu0 %vm2265_vm2, %v2264_v1  ;;  %v179_v11 = vld [vmem:[%s2323_s25 + $0x18] sm:$0xff]  ;;  %v1644_v12 = vld [vmem:[%s2323_s25 + $0xe0] sm:$0xff]  ;;  %v1645_v14 = vld [vmem:[%s2323_s25 + $0xe8] sm:$0xff] }
  0x13   : > { %1919 = vmatpush3.msra.mxu0 %v171_v4  ;;  %2001 = vmatprep.subr.mxu1 %v2264_v1  ;;  %v180_v13 = vld [vmem:[%s2323_s25 + $0x20] sm:$0xff]  ;;  %v181_v15 = vld [vmem:[%s2323_s25 + $0x28] sm:$0xff]  ;;  %v1646_v16 = vld [vmem:[%s2323_s25 + $0xf0] sm:$0xff] }
  0x14   : > { %1921 = vmatmul.mubr.msk.f32.vlgmr.msra.gmra.mxu0 %vm207_vm1, %v176_v5  ;;  %2002 = vmatpush3.msra.mxu1 %v171_v4  ;;  %v182_v17 = vld [vmem:[%s2323_s25 + $0x30] sm:$0xff]  ;;  %v1647_v18 = vld [vmem:[%s2323_s25 + $0xf8] sm:$0xff]  ;;  %v1648_v20 = vld [vmem:[%s2323_s25 + $0x100] sm:$0xff] }
  0x15   : > { %2003 = vmatprep.mubr.msk.f32.mxu1 %vm2265_vm2, %v2264_v1  ;;  %2078 = vmatprep.subr.mxu0 %v2264_v1  ;;  %v183_v19 = vld [vmem:[%s2323_s25 + $0x38] sm:$0xff]  ;;  %v184_v21 = vld [vmem:[%s2323_s25 + $0x40] sm:$0xff]  ;;  %v1649_v22 = vld [vmem:[%s2323_s25 + $0x108] sm:$0xff] }
  0x16   : > { %2004 = vmatmul.mubr.msk.f32.vlgmr.msra.gmra.mxu1 %vm207_vm1, %v1641_v6  ;;  %2079 = vmatpush3.msk.msra.mxu0 %vm283_vm0, %v174_v0  ;;  %v185_v23 = vld [vmem:[%s2323_s25 + $0x48] sm:$0xff]  ;;  %v1650_v24 = vld [vmem:[%s2323_s25 + $0x110] sm:$0xff]  ;;  %v1651_v26 = vld [vmem:[%s2323_s25 + $0x118] sm:$0xff] }
  0x17   : > { %2161 = vmatprep.subr.mxu1 %v2264_v1  ;;  %1923 = vmatprep.mubr.msk.f32.mxu0 %vm2265_vm2, %v2264_v1  ;;  %v186_v25 = vld [vmem:[%s2323_s25 + $0x50] sm:$0xff]  ;;  %v187_v27 = vld [vmem:[%s2323_s25 + $0x58] sm:$0xff]  ;;  %v1652_v28 = vld [vmem:[%s2323_s25 + $0x120] sm:$0xff] }
  0x18   : > { %2162 = vmatpush3.msk.msra.mxu1 %vm283_vm0, %v174_v0  ;;  %1924 = vmatmul.mubr.msk.f32.gmra.mxu0 %vm207_vm1, %v177_v7  ;;  %v188_v29 = vld [vmem:[%s2323_s25 + $0x60] sm:$0xff]  ;;  %v1653_v30 = vld [vmem:[%s2323_s25 + $0x128] sm:$0xff]  ;;  %v1654_v32 = vld [vmem:[%s2323_s25 + $0x130] sm:$0xff] }
  0x19   : > { %2006 = vmatprep.mubr.msk.f32.mxu1 %vm2265_vm2, %v2264_v1  ;;  %1926 = vmatprep.mubr.msk.f32.mxu0 %vm2265_vm2, %v2264_v1  ;;  %v189_v31 = vld [vmem:[%s2323_s25 + $0x68] sm:$0xff]  ;;  %v190_v33 = vld [vmem:[%s2323_s25 + $0x70] sm:$0xff]  ;;  %v1655_v34 = vld [vmem:[%s2323_s25 + $0x138] sm:$0xff] }
  0x1a   : > { %2007 = vmatmul.mubr.msk.f32.gmra.mxu1 %vm207_vm1, %v1642_v8  ;;  %2080 = vmatprep.subr.mxu0 %v2264_v1  ;;  %v191_v35 = vld [vmem:[%s2323_s25 + $0x78] sm:$0xff]  ;;  %v1656_v36 = vld [vmem:[%s2323_s25 + $0x140] sm:$0xff]  ;;  %v1657_v38 = vld [vmem:[%s2323_s25 + $0x148] sm:$0xff] }
  0x1b   : > { %2009 = vmatprep.mubr.msk.f32.mxu1 %vm2265_vm2, %v2264_v1  ;;  %2081 = vmatpush3.msra.mxu0 %v173_v2  ;;  %v192_v37 = vld [vmem:[%s2323_s25 + $0x80] sm:$0xff]  ;;  %v193_v39 = vld [vmem:[%s2323_s25 + $0x88] sm:$0xff]  ;;  %v1658_v40 = vld [vmem:[%s2323_s25 + $0x150] sm:$0xff] }
  0x1c   : > { %1927 = vmatmul.mubr.msk.f32.gmra.mxu0 %vm207_vm1, %v178_v9  ;;  %2163 = vmatprep.subr.mxu1 %v2264_v1  ;;  %v194_v41 = vld [vmem:[%s2323_s25 + $0x90] sm:$0xff]  ;;  %v1659_v42 = vld [vmem:[%s2323_s25 + $0x158] sm:$0xff]  ;;  %v1660_v44 = vld [vmem:[%s2323_s25 + $0x160] sm:$0xff] }
  0x1d   : > { %1929 = vmatprep.mubr.msk.f32.mxu0 %vm2265_vm2, %v2264_v1  ;;  %2164 = vmatpush3.msra.mxu1 %v173_v2  ;;  %v195_v43 = vld [vmem:[%s2323_s25 + $0x98] sm:$0xff]  ;;  %v196_v45 = vld [vmem:[%s2323_s25 + $0xa0] sm:$0xff]  ;;  %v1661_v46 = vld [vmem:[%s2323_s25 + $0x168] sm:$0xff] }
  0x1e   : > { %2010 = vmatmul.mubr.msk.f32.gmra.mxu1 %vm207_vm1, %v1643_v10  ;;  %2082 = vmatprep.subr.mxu0 %v2264_v1  ;;  %v197_v47 = vld [vmem:[%s2323_s25 + $0xa8] sm:$0xff]  ;;  %v1662_v48 = vld [vmem:[%s2323_s25 + $0x170] sm:$0xff]  ;;  %v1663_v50 = vld [vmem:[%s2323_s25 + $0x178] sm:$0xff] }
  0x1f   : > { %2012 = vmatprep.mubr.msk.f32.mxu1 %vm2265_vm2, %v2264_v1  ;;  %2083 = vmatpush3.msra.mxu0 %v172_v3  ;;  %v198_v49 = vld [vmem:[%s2323_s25 + $0xb0] sm:$0xff]  ;;  %v199_v51 = vld [vmem:[%s2323_s25 + $0xb8] sm:$0xff]  ;;  %v1664_v52 = vld [vmem:[%s2323_s25 + $0x180] sm:$0xff] }
  0x20   : > { %1930 = vmatmul.mubr.msk.f32.gmra.mxu0 %vm207_vm1, %v179_v11  ;;  %2165 = vmatprep.subr.mxu1 %v2264_v1  ;;  %v200_v53 = vld [vmem:[%s2323_s25 + $0xc0] sm:$0xf]  ;;  %v1665_v54 = vld [vmem:[%s2323_s25 + $0x188] sm:$0xf]  ;;  %v1692_v55 = vld [vmem:[%s2323_s25 + $0x190] sm:$0xff] }
  0x21   : > { %1932 = vmatprep.mubr.msk.f32.mxu0 %vm2265_vm2, %v2264_v1  ;;  %2166 = vmatpush3.msra.mxu1 %v172_v3  ;;  %v1743_v56 = vld [vmem:[%s2323_s25 + $0x258] sm:$0xff]  ;;  %v1744_v58 = vld [vmem:[%s2323_s25 + $0x260] sm:$0xff]  ;;  %v1745_v60 = vld [vmem:[%s2323_s25 + $0x268] sm:$0xff] }
  0x22   : > { %2013 = vmatmul.mubr.msk.f32.gmra.mxu1 %vm207_vm1, %v1644_v12  ;;  %2084 = vmatprep.subr.mxu0 %v2264_v1  ;;  %v1693_v57 = vld [vmem:[%s2323_s25 + $0x198] sm:$0xff]  ;;  %v1694_v59 = vld [vmem:[%s2323_s25 + $0x1a0] sm:$0xff]  ;;  %v1695_v61 = vld [vmem:[%s2323_s25 + $0x1a8] sm:$0xff] }
  0x23   : > { %2015 = vmatprep.mubr.msk.f32.mxu1 %vm2265_vm2, %v2264_v1  ;;  %2085 = vmatpush3.msra.mxu0 %v171_v4  ;;  %v1746_v62 = vld [vmem:[%s2323_s25 + $0x270] sm:$0xff]  ;;  %v1747_v0 = vld [vmem:[%s2323_s25 + $0x278] sm:$0xff]  ;;  %v1748_v3 = vld [vmem:[%s2323_s25 + $0x280] sm:$0xff] }
  0x24   : > { %1933 = vmatmul.mubr.msk.f32.gmra.mxu0 %vm207_vm1, %v180_v13  ;;  %2167 = vmatprep.subr.mxu1 %v2264_v1  ;;  %v1696_v63 = vld [vmem:[%s2323_s25 + $0x1b0] sm:$0xff]  ;;  %v1697_v2 = vld [vmem:[%s2323_s25 + $0x1b8] sm:$0xff]  ;;  %v1749_v5 = vld [vmem:[%s2323_s25 + $0x288] sm:$0xff] }
  0x25   : > { %1935 = vmatprep.mubr.msk.f32.mxu0 %vm2265_vm2, %v2264_v1  ;;  %2168 = vmatpush3.msra.mxu1 %v171_v4  ;;  %v1698_v4 = vld [vmem:[%s2323_s25 + $0x1c0] sm:$0xff]  ;;  %v1699_v6 = vld [vmem:[%s2323_s25 + $0x1c8] sm:$0xff]  ;;  %v1750_v7 = vld [vmem:[%s2323_s25 + $0x290] sm:$0xff] }
  0x26   : > { %2016 = vmatmul.mubr.msk.f32.gmra.mxu1 %vm207_vm1, %v1645_v14  ;;  %v1700_v8 = vld [vmem:[%s2323_s25 + $0x1d0] sm:$0xff]  ;;  %v1751_v9 = vld [vmem:[%s2323_s25 + $0x298] sm:$0xff]  ;;  %v1752_v11 = vld [vmem:[%s2323_s25 + $0x2a0] sm:$0xff] }
  0x27   : > { %2018 = vmatprep.mubr.msk.f32.mxu1 %vm2265_vm2, %v2264_v1  ;;  %v1701_v10 = vld [vmem:[%s2323_s25 + $0x1d8] sm:$0xff]  ;;  %v1702_v12 = vld [vmem:[%s2323_s25 + $0x1e0] sm:$0xff]  ;;  %v1753_v13 = vld [vmem:[%s2323_s25 + $0x2a8] sm:$0xff] }
  0x28   : > { %1936 = vmatmul.mubr.msk.f32.gmra.mxu0 %vm207_vm1, %v181_v15  ;;  %v1703_v14 = vld [vmem:[%s2323_s25 + $0x1e8] sm:$0xff]  ;;  %v1754_v15 = vld [vmem:[%s2323_s25 + $0x2b0] sm:$0xff] }
  0x29   : > { %1938 = vmatprep.mubr.msk.f32.mxu0 %vm2265_vm2, %v2264_v1 }
  0x2a   : > { %2019 = vmatmul.mubr.msk.f32.gmra.mxu1 %vm207_vm1, %v1646_v16  ;;  %v1704_v16 = vld [vmem:[%s2323_s25 + $0x1f0] sm:$0xff] }
  0x2b   : > { %2021 = vmatprep.mubr.msk.f32.mxu1 %vm2265_vm2, %v2264_v1 }
  0x2c   : > { %1939 = vmatmul.mubr.msk.f32.gmra.mxu0 %vm207_vm1, %v182_v17  ;;  %v1755_v17 = vld [vmem:[%s2323_s25 + $0x2b8] sm:$0xff] }
  0x2d   : > { %1941 = vmatprep.mubr.msk.f32.mxu0 %vm2265_vm2, %v2264_v1 }
  0x2e   : > { %2022 = vmatmul.mubr.msk.f32.gmra.mxu1 %vm207_vm1, %v1647_v18  ;;  %v1705_v18 = vld [vmem:[%s2323_s25 + $0x1f8] sm:$0xff] }
  0x2f   : > { %2024 = vmatprep.mubr.msk.f32.mxu1 %vm2265_vm2, %v2264_v1 }
  0x30   : > { %1942 = vmatmul.mubr.msk.f32.gmra.mxu0 %vm207_vm1, %v183_v19  ;;  %v1756_v19 = vld [vmem:[%s2323_s25 + $0x2c0] sm:$0xff] }
  0x31   : > { %1944 = vmatprep.mubr.msk.f32.mxu0 %vm2265_vm2, %v2264_v1 }
  0x32   : > { %2025 = vmatmul.mubr.msk.f32.gmra.mxu1 %vm207_vm1, %v1648_v20  ;;  %v1706_v20 = vld [vmem:[%s2323_s25 + $0x200] sm:$0xff] }
  0x33   : > { %2027 = vmatprep.mubr.msk.f32.mxu1 %vm2265_vm2, %v2264_v1 }
  0x34   : > { %1945 = vmatmul.mubr.msk.f32.gmra.mxu0 %vm207_vm1, %v184_v21  ;;  %v1757_v21 = vld [vmem:[%s2323_s25 + $0x2c8] sm:$0xff] }
  0x35   : > { %1947 = vmatprep.mubr.msk.f32.mxu0 %vm2265_vm2, %v2264_v1 }
  0x36   : > { %2028 = vmatmul.mubr.msk.f32.gmra.mxu1 %vm207_vm1, %v1649_v22  ;;  %v1707_v22 = vld [vmem:[%s2323_s25 + $0x208] sm:$0xff] }
  0x37   : > { %2030 = vmatprep.mubr.msk.f32.mxu1 %vm2265_vm2, %v2264_v1 }
  0x38   : > { %1948 = vmatmul.mubr.msk.f32.gmra.mxu0 %vm207_vm1, %v185_v23  ;;  %v1758_v23 = vld [vmem:[%s2323_s25 + $0x2d0] sm:$0xff] }
  0x39   : > { %1950 = vmatprep.mubr.msk.f32.mxu0 %vm2265_vm2, %v2264_v1 }
  0x3a   : > { %2031 = vmatmul.mubr.msk.f32.gmra.mxu1 %vm207_vm1, %v1650_v24  ;;  %v1708_v24 = vld [vmem:[%s2323_s25 + $0x210] sm:$0xff] }
  0x3b   : > { %2033 = vmatprep.mubr.msk.f32.mxu1 %vm2265_vm2, %v2264_v1 }
  0x3c   : > { %1951 = vmatmul.mubr.msk.f32.gmra.mxu0 %vm207_vm1, %v186_v25  ;;  %v1759_v25 = vld [vmem:[%s2323_s25 + $0x2d8] sm:$0xff] }
  0x3d   : > { %1953 = vmatprep.mubr.msk.f32.mxu0 %vm2265_vm2, %v2264_v1 }
  0x3e   : > { %2034 = vmatmul.mubr.msk.f32.gmra.mxu1 %vm207_vm1, %v1651_v26  ;;  %v1709_v26 = vld [vmem:[%s2323_s25 + $0x218] sm:$0xff] }
  0x3f   : > { %2036 = vmatprep.mubr.msk.f32.mxu1 %vm2265_vm2, %v2264_v1 }
  0x40   : > { %1954 = vmatmul.mubr.msk.f32.gmra.mxu0 %vm207_vm1, %v187_v27  ;;  %v1760_v27 = vld [vmem:[%s2323_s25 + $0x2e0] sm:$0xff] }
  0x41   : > { %1956 = vmatprep.mubr.msk.f32.mxu0 %vm2265_vm2, %v2264_v1 }
  0x42   : > { %2037 = vmatmul.mubr.msk.f32.gmra.mxu1 %vm207_vm1, %v1652_v28  ;;  %v1710_v28 = vld [vmem:[%s2323_s25 + $0x220] sm:$0xff] }
  0x43   : > { %2039 = vmatprep.mubr.msk.f32.mxu1 %vm2265_vm2, %v2264_v1 }
  0x44   : > { %1957 = vmatmul.mubr.msk.f32.gmra.mxu0 %vm207_vm1, %v188_v29  ;;  %v1761_v29 = vld [vmem:[%s2323_s25 + $0x2e8] sm:$0xff] }
  0x45   : > { %1959 = vmatprep.mubr.msk.f32.mxu0 %vm2265_vm2, %v2264_v1 }
  0x46   : > { %2040 = vmatmul.mubr.msk.f32.gmra.mxu1 %vm207_vm1, %v1653_v30  ;;  %v1711_v30 = vld [vmem:[%s2323_s25 + $0x228] sm:$0xff] }
  0x47   : > { %2042 = vmatprep.mubr.msk.f32.mxu1 %vm2265_vm2, %v2264_v1 }
  0x48   : > { %1960 = vmatmul.mubr.msk.f32.gmra.mxu0 %vm207_vm1, %v189_v31  ;;  %v1762_v31 = vld [vmem:[%s2323_s25 + $0x2f0] sm:$0xff] }
  0x49   : > { %1962 = vmatprep.mubr.msk.f32.mxu0 %vm2265_vm2, %v2264_v1 }
  0x4a   : > { %2043 = vmatmul.mubr.msk.f32.gmra.mxu1 %vm207_vm1, %v1654_v32  ;;  %v1712_v32 = vld [vmem:[%s2323_s25 + $0x230] sm:$0xff] }
  0x4b   : > { %2045 = vmatprep.mubr.msk.f32.mxu1 %vm2265_vm2, %v2264_v1 }
  0x4c   : > { %1963 = vmatmul.mubr.msk.f32.gmra.mxu0 %vm207_vm1, %v190_v33  ;;  %v1763_v33 = vld [vmem:[%s2323_s25 + $0x2f8] sm:$0xff] }
  0x4d   : > { %1965 = vmatprep.mubr.msk.f32.mxu0 %vm2265_vm2, %v2264_v1 }
  0x4e   : > { %2046 = vmatmul.mubr.msk.f32.gmra.mxu1 %vm207_vm1, %v1655_v34  ;;  %v1713_v34 = vld [vmem:[%s2323_s25 + $0x238] sm:$0xff] }
  0x4f   : > { %2048 = vmatprep.mubr.msk.f32.mxu1 %vm2265_vm2, %v2264_v1 }
  0x50   : > { %1966 = vmatmul.mubr.msk.f32.gmra.mxu0 %vm207_vm1, %v191_v35  ;;  %v1764_v35 = vld [vmem:[%s2323_s25 + $0x300] sm:$0xff] }
  0x51   : > { %1968 = vmatprep.mubr.msk.f32.mxu0 %vm2265_vm2, %v2264_v1 }
  0x52   : > { %2049 = vmatmul.mubr.msk.f32.gmra.mxu1 %vm207_vm1, %v1656_v36  ;;  %v1714_v36 = vld [vmem:[%s2323_s25 + $0x240] sm:$0xff] }
  0x53   : > { %2051 = vmatprep.mubr.msk.f32.mxu1 %vm2265_vm2, %v2264_v1 }
  0x54   : > { %1969 = vmatmul.mubr.msk.f32.gmra.mxu0 %vm207_vm1, %v192_v37  ;;  %v1765_v37 = vld [vmem:[%s2323_s25 + $0x308] sm:$0xff] }
  0x55   : > { %1971 = vmatprep.mubr.msk.f32.mxu0 %vm2265_vm2, %v2264_v1 }
  0x56   : > { %2052 = vmatmul.mubr.msk.f32.gmra.mxu1 %vm207_vm1, %v1657_v38  ;;  %v1715_v38 = vld [vmem:[%s2323_s25 + $0x248] sm:$0xff] }
  0x57   : > { %2054 = vmatprep.mubr.msk.f32.mxu1 %vm2265_vm2, %v2264_v1 }
  0x58   : > { %1972 = vmatmul.mubr.msk.f32.gmra.mxu0 %vm207_vm1, %v193_v39  ;;  %v2724_v39 = vld [vmem:[%s2974_s2] ss:$0 sm:$0xff] }
  0x59   : > { %1974 = vmatprep.mubr.msk.f32.mxu0 %vm2265_vm2, %v2264_v1 }
  0x5a   : > { %2055 = vmatmul.mubr.msk.f32.gmra.mxu1 %vm207_vm1, %v1658_v40  ;;  %v1766_v40 = vld [vmem:[%s2323_s25 + $0x310] sm:$0xff] }
  0x5b   : > { %2057 = vmatprep.mubr.msk.f32.mxu1 %vm2265_vm2, %v2264_v1 }
  0x5c   : > { %1975 = vmatmul.mubr.msk.f32.gmra.mxu0 %vm207_vm1, %v194_v41 }
  0x5d   : > { %1977 = vmatprep.mubr.msk.f32.mxu0 %vm2265_vm2, %v2264_v1 }
  0x5e   : > { %2058 = vmatmul.mubr.msk.f32.gmra.mxu1 %vm207_vm1, %v1659_v42 }
  0x5f   : > { %2060 = vmatprep.mubr.msk.f32.mxu1 %vm2265_vm2, %v2264_v1 }
  0x60   : > { %1978 = vmatmul.mubr.msk.f32.gmra.mxu0 %vm207_vm1, %v195_v43  ;;  %v1716_v43 = vld [vmem:[%s2323_s25 + $0x250] sm:$0xf] }
  0x61   : > { %1980 = vmatprep.mubr.msk.f32.mxu0 %vm2265_vm2, %v2264_v1 }
  0x62   : > { %2061 = vmatmul.mubr.msk.f32.gmra.mxu1 %vm207_vm1, %v1660_v44 }
  0x63   : > { %2063 = vmatprep.mubr.msk.f32.mxu1 %vm2265_vm2, %v2264_v1 }
  0x64   : > { %1981 = vmatmul.mubr.msk.f32.gmra.mxu0 %vm207_vm1, %v196_v45 }
  0x65   : > { %1983 = vmatprep.mubr.msk.f32.mxu0 %vm2265_vm2, %v2264_v1 }
  0x66   : > { %2064 = vmatmul.mubr.msk.f32.gmra.mxu1 %vm207_vm1, %v1661_v46 }
  0x67   : > { %2066 = vmatprep.mubr.msk.f32.mxu1 %vm2265_vm2, %v2264_v1 }
  0x68   : > { %1984 = vmatmul.mubr.msk.f32.gmra.mxu0 %vm207_vm1, %v197_v47 }
  0x69   : > { %1986 = vmatprep.mubr.msk.f32.mxu0 %vm2265_vm2, %v2264_v1 }
  0x6a   : > { %2067 = vmatmul.mubr.msk.f32.gmra.mxu1 %vm207_vm1, %v1662_v48  ;;  %v1767_v48 = vld [vmem:[%s2323_s25 + $0x318] sm:$0xf] }
  0x6b   : > { %2069 = vmatprep.mubr.msk.f32.mxu1 %vm2265_vm2, %v2264_v1 }
  0x6c   : > { %1987 = vmatmul.mubr.msk.f32.gmra.mxu0 %vm207_vm1, %v198_v49 }
  0x6d   : > { %1989 = vmatprep.mubr.msk.f32.mxu0 %vm2265_vm2, %v2264_v1 }
  0x6e   : > { %2070 = vmatmul.mubr.msk.f32.gmra.mxu1 %vm207_vm1, %v1663_v50 }
  0x6f   : > { %2072 = vmatprep.mubr.msk.f32.mxu1 %vm2265_vm2, %v2264_v1 }
  0x70   : > { %1990 = vmatmul.mubr.msk.f32.gmra.mxu0 %vm207_vm1, %v199_v51 }
  0x71   : > { %1992 = vmatprep.mubr.msk.f32.mxu0 %vm2265_vm2, %v2264_v1 }
  0x72   : > { %2073 = vmatmul.mubr.msk.f32.gmra.mxu1 %vm207_vm1, %v1664_v52 }
  0x73   : > { %2075 = vmatprep.mubr.msk.f32.mxu1 %vm2265_vm2, %v2264_v1 }
  0x74   : > { %1993 = vmatmul.mubr.msk.f32.gmra.mxu0 %vm207_vm1, %v200_v53 }
  0x75   : > { %2086 = vmatprep.mubr.msk.f32.mxu0 %vm2265_vm2, %v2264_v1 }
  0x76   : > { %2076 = vmatmul.mubr.msk.f32.gmra.mxu1 %vm207_vm1, %v1665_v54 }
  0x77   : > { %2169 = vmatprep.mubr.msk.f32.mxu1 %vm2265_vm2, %v2264_v1 }
  0x78   : > { %2087 = vmatmul.mubr.msk.f32.vlgmr.msra.gmra.mxu0 %vm207_vm1, %v1692_v55 }
  0x79   : > { %2089 = vmatprep.mubr.msk.f32.mxu0 %vm2265_vm2, %v2264_v1 }
  0x7a   : > { %2170 = vmatmul.mubr.msk.f32.vlgmr.msra.gmra.mxu1 %vm207_vm1, %v1743_v56 }
  0x7b   : > { %2172 = vmatprep.mubr.msk.f32.mxu1 %vm2265_vm2, %v2264_v1 }
  0x7c   : > { %2090 = vmatmul.mubr.msk.f32.gmra.mxu0 %vm207_vm1, %v1693_v57 }
  0x7d   : > { %2092 = vmatprep.mubr.msk.f32.mxu0 %vm2265_vm2, %v2264_v1 }
  0x7e   : > { %2173 = vmatmul.mubr.msk.f32.gmra.mxu1 %vm207_vm1, %v1744_v58 }
  0x7f   : > { %2175 = vmatprep.mubr.msk.f32.mxu1 %vm2265_vm2, %v2264_v1 }
  0x80   : > { %2093 = vmatmul.mubr.msk.f32.gmra.mxu0 %vm207_vm1, %v1694_v59 }
  0x81   : > { %2095 = vmatprep.mubr.msk.f32.mxu0 %vm2265_vm2, %v2264_v1 }
  0x82   : > { %2176 = vmatmul.mubr.msk.f32.gmra.mxu1 %vm207_vm1, %v1745_v60 }
  0x83   : > { %2178 = vmatprep.mubr.msk.f32.mxu1 %vm2265_vm2, %v2264_v1 }
  0x84   : > { %2096 = vmatmul.mubr.msk.f32.gmra.mxu0 %vm207_vm1, %v1695_v61 }
  0x85   : > { %2098 = vmatprep.mubr.msk.f32.mxu0 %vm2265_vm2, %v2264_v1 }
  0x86   : > { %2179 = vmatmul.mubr.msk.f32.gmra.mxu1 %vm207_vm1, %v1746_v62 }
  0x87   : > { %2181 = vmatprep.mubr.msk.f32.mxu1 %vm2265_vm2, %v2264_v1 }
  0x88   : > { %2099 = vmatmul.mubr.msk.f32.gmra.mxu0 %vm207_vm1, %v1696_v63 }
  0x89   : > { %2101 = vmatprep.mubr.msk.f32.mxu0 %vm2265_vm2, %v2264_v1 }
  0x8a   : > { %2182 = vmatmul.mubr.msk.f32.gmra.mxu1 %vm207_vm1, %v1747_v0 }
  0x8b   : > { %2184 = vmatprep.mubr.msk.f32.mxu1 %vm2265_vm2, %v2264_v1 }
  0x8c   : > { %2102 = vmatmul.mubr.msk.f32.gmra.mxu0 %vm207_vm1, %v1697_v2 }
  0x8d   : > { %2104 = vmatprep.mubr.msk.f32.mxu0 %vm2265_vm2, %v2264_v1 }
  0x8e   : > { %2185 = vmatmul.mubr.msk.f32.gmra.mxu1 %vm207_vm1, %v1748_v3 }
  0x8f   : > { %2187 = vmatprep.mubr.msk.f32.mxu1 %vm2265_vm2, %v2264_v1 }
  0x90   : > { %2105 = vmatmul.mubr.msk.f32.gmra.mxu0 %vm207_vm1, %v1698_v4 }
  0x91   : > { %2107 = vmatprep.mubr.msk.f32.mxu0 %vm2265_vm2, %v2264_v1 }
  0x92   : > { %2188 = vmatmul.mubr.msk.f32.gmra.mxu1 %vm207_vm1, %v1749_v5 }
  0x93   : > { %2190 = vmatprep.mubr.msk.f32.mxu1 %vm2265_vm2, %v2264_v1 }
  0x94   : > { %2108 = vmatmul.mubr.msk.f32.gmra.mxu0 %vm207_vm1, %v1699_v6 }
  0x95   : > { %2110 = vmatprep.mubr.msk.f32.mxu0 %vm2265_vm2, %v2264_v1 }
  0x96   : > { %2191 = vmatmul.mubr.msk.f32.gmra.mxu1 %vm207_vm1, %v1750_v7 }
  0x97   : > { %2193 = vmatprep.mubr.msk.f32.mxu1 %vm2265_vm2, %v2264_v1 }
  0x98   : > { %2111 = vmatmul.mubr.msk.f32.gmra.mxu0 %vm207_vm1, %v1700_v8 }
  0x99   : > { %2113 = vmatprep.mubr.msk.f32.mxu0 %vm2265_vm2, %v2264_v1 }
  0x9a   : > { %2194 = vmatmul.mubr.msk.f32.gmra.mxu1 %vm207_vm1, %v1751_v9 }
  0x9b   : > { %2196 = vmatprep.mubr.msk.f32.mxu1 %vm2265_vm2, %v2264_v1 }
  0x9c   : > { %2114 = vmatmul.mubr.msk.f32.gmra.mxu0 %vm207_vm1, %v1701_v10 }
  0x9d   : > { %2116 = vmatprep.mubr.msk.f32.mxu0 %vm2265_vm2, %v2264_v1 }
  0x9e   : > { %2197 = vmatmul.mubr.msk.f32.gmra.mxu1 %vm207_vm1, %v1752_v11 }
  0x9f   : > { %2199 = vmatprep.mubr.msk.f32.mxu1 %vm2265_vm2, %v2264_v1 }
  0xa0   : > { %2117 = vmatmul.mubr.msk.f32.gmra.mxu0 %vm207_vm1, %v1702_v12 }
  0xa1   : > { %2119 = vmatprep.mubr.msk.f32.mxu0 %vm2265_vm2, %v2264_v1 }
  0xa2   : > { %2200 = vmatmul.mubr.msk.f32.gmra.mxu1 %vm207_vm1, %v1753_v13 }
  0xa3   : > { %2202 = vmatprep.mubr.msk.f32.mxu1 %vm2265_vm2, %v2264_v1 }
  0xa4   : > { %2120 = vmatmul.mubr.msk.f32.gmra.mxu0 %vm207_vm1, %v1703_v14 }
  0xa5   : > { %2122 = vmatprep.mubr.msk.f32.mxu0 %vm2265_vm2, %v2264_v1 }
  0xa6   : > { %2203 = vmatmul.mubr.msk.f32.gmra.mxu1 %vm207_vm1, %v1754_v15 }
  0xa7   : > { %2205 = vmatprep.mubr.msk.f32.mxu1 %vm2265_vm2, %v2264_v1 }
  0xa8   : > { %2123 = vmatmul.mubr.msk.f32.gmra.mxu0 %vm207_vm1, %v1704_v16 }
  0xa9   : > { %2125 = vmatprep.mubr.msk.f32.mxu0 %vm2265_vm2, %v2264_v1 }
  0xaa   : > { %2206 = vmatmul.mubr.msk.f32.gmra.mxu1 %vm207_vm1, %v1755_v17 }
  0xab   : > { %2208 = vmatprep.mubr.msk.f32.mxu1 %vm2265_vm2, %v2264_v1 }
  0xac   : > { %2126 = vmatmul.mubr.msk.f32.gmra.mxu0 %vm207_vm1, %v1705_v18 }
  0xad   : > { %2128 = vmatprep.mubr.msk.f32.mxu0 %vm2265_vm2, %v2264_v1 }
  0xae   : > { %2209 = vmatmul.mubr.msk.f32.gmra.mxu1 %vm207_vm1, %v1756_v19 }
  0xaf   : > { %2211 = vmatprep.mubr.msk.f32.mxu1 %vm2265_vm2, %v2264_v1 }
  0xb0   : > { %2129 = vmatmul.mubr.msk.f32.gmra.mxu0 %vm207_vm1, %v1706_v20 }
  0xb1   : > { %2131 = vmatprep.mubr.msk.f32.mxu0 %vm2265_vm2, %v2264_v1 }
  0xb2   : > { %2212 = vmatmul.mubr.msk.f32.gmra.mxu1 %vm207_vm1, %v1757_v21 }
  0xb3   : > { %2214 = vmatprep.mubr.msk.f32.mxu1 %vm2265_vm2, %v2264_v1 }
  0xb4   : > { %2132 = vmatmul.mubr.msk.f32.gmra.mxu0 %vm207_vm1, %v1707_v22 }
  0xb5   : > { %2134 = vmatprep.mubr.msk.f32.mxu0 %vm2265_vm2, %v2264_v1 }
  0xb6   : > { %2215 = vmatmul.mubr.msk.f32.gmra.mxu1 %vm207_vm1, %v1758_v23 }
  0xb7   : > { %2217 = vmatprep.mubr.msk.f32.mxu1 %vm2265_vm2, %v2264_v1 }
  0xb8   : > { %2135 = vmatmul.mubr.msk.f32.gmra.mxu0 %vm207_vm1, %v1708_v24 }
  0xb9   : > { %2137 = vmatprep.mubr.msk.f32.mxu0 %vm2265_vm2, %v2264_v1 }
  0xba   : > { %2218 = vmatmul.mubr.msk.f32.gmra.mxu1 %vm207_vm1, %v1759_v25 }
  0xbb   : > { %2220 = vmatprep.mubr.msk.f32.mxu1 %vm2265_vm2, %v2264_v1 }
  0xbc   : > { %2138 = vmatmul.mubr.msk.f32.gmra.mxu0 %vm207_vm1, %v1709_v26 }
  0xbd   : > { %2140 = vmatprep.mubr.msk.f32.mxu0 %vm2265_vm2, %v2264_v1 }
  0xbe   : > { %2221 = vmatmul.mubr.msk.f32.gmra.mxu1 %vm207_vm1, %v1760_v27 }
  0xbf   : > { %2223 = vmatprep.mubr.msk.f32.mxu1 %vm2265_vm2, %v2264_v1 }
  0xc0   : > { %2141 = vmatmul.mubr.msk.f32.gmra.mxu0 %vm207_vm1, %v1710_v28 }
  0xc1   : > { %2143 = vmatprep.mubr.msk.f32.mxu0 %vm2265_vm2, %v2264_v1 }
  0xc2   : > { %2224 = vmatmul.mubr.msk.f32.gmra.mxu1 %vm207_vm1, %v1761_v29 }
  0xc3   : > { %2226 = vmatprep.mubr.msk.f32.mxu1 %vm2265_vm2, %v2264_v1 }
  0xc4   : > { %2144 = vmatmul.mubr.msk.f32.gmra.mxu0 %vm207_vm1, %v1711_v30 }
  0xc5   : > { %2146 = vmatprep.mubr.msk.f32.mxu0 %vm2265_vm2, %v2264_v1 }
  0xc6   : > { %2227 = vmatmul.mubr.msk.f32.gmra.mxu1 %vm207_vm1, %v1762_v31 }
  0xc7   : > { %2229 = vmatprep.mubr.msk.f32.mxu1 %vm2265_vm2, %v2264_v1 }
  0xc8   : > { %2147 = vmatmul.mubr.msk.f32.gmra.mxu0 %vm207_vm1, %v1712_v32 }
  0xc9   : > { %2149 = vmatprep.mubr.msk.f32.mxu0 %vm2265_vm2, %v2264_v1 }
  0xca   : > { %2230 = vmatmul.mubr.msk.f32.gmra.mxu1 %vm207_vm1, %v1763_v33 }
  0xcb   : > { %2232 = vmatprep.mubr.msk.f32.mxu1 %vm2265_vm2, %v2264_v1 }
  0xcc   : > { %2150 = vmatmul.mubr.msk.f32.gmra.mxu0 %vm207_vm1, %v1713_v34 }
  0xcd   : > { %2152 = vmatprep.mubr.msk.f32.mxu0 %vm2265_vm2, %v2264_v1 }
  0xce   : > { %2233 = vmatmul.mubr.msk.f32.gmra.mxu1 %vm207_vm1, %v1764_v35 }
  0xcf   : > { %2235 = vmatprep.mubr.msk.f32.mxu1 %vm2265_vm2, %v2264_v1 }
  0xd0   : > { %2153 = vmatmul.mubr.msk.f32.gmra.mxu0 %vm207_vm1, %v1714_v36 }
  0xd1   : > { %2155 = vmatprep.mubr.msk.f32.mxu0 %vm2265_vm2, %v2264_v1 }
  0xd2   : > { %2236 = vmatmul.mubr.msk.f32.gmra.mxu1 %vm207_vm1, %v1765_v37 }
  0xd3   : > { %2238 = vmatprep.mubr.msk.f32.mxu1 %vm2265_vm2, %v2264_v1 }
  0xd4   : > { %v353_v41 = vpop.f32.mrf.mxu0  ;;  %2156 = vmatmul.mubr.msk.f32.gmra.mxu0 %vm207_vm1, %v1715_v38 }
  0xd5   : > { %v354_v42 = vadd.f32 %v2724_v39, %v353_v41  ;;  %2158 = vmatprep.mubr.msk.f32.mxu0 %vm2265_vm2, %v2264_v1 }
  0xd6   : > { %v669_v44 = vpop.f32.mrf.mxu1  ;;  %2239 = vmatmul.mubr.msk.f32.gmra.mxu1 %vm207_vm1, %v1766_v40  ;;  %v1922_v45 = vpop.f32.mrf.mxu0 }
  0xd7   : > { %v477_v46 = vmax.f32 %v354_v42, 0.0  ;;  %v670_v47 = vadd.f32 %v2724_v39, %v669_v44  ;;  %2241 = vmatprep.mubr.msk.f32.mxu1 %vm2265_vm2, %v2264_v1 }
  0xd8   : > { %v2005_v49 = vpop.f32.mrf.mxu1  ;;  %v358_v50 = vpop.f32.mrf.mxu0  ;;  %2159 = vmatmul.mubr.msk.f32.gmra.mxu0 %vm207_vm1, %v1716_v43 }
  0xd9   : > { %v793_v51 = vmax.f32 %v670_v47, 0.0  ;;  %v359_v52 = vadd.f32 %v2724_v39, %v358_v50 }
  0xda   : > { %v674_v53 = vpop.f32.mrf.mxu1  ;;  %2242 = vmatmul.mubr.msk.f32.gmra.mxu1 %vm207_vm1, %v1767_v48  ;;  %v1925_v54 = vpop.f32.mrf.mxu0 }
  0xdb   : > { %v2742_v55 = vmax.f32 %v477_v46, %v793_v51  ;;  %v478_v56 = vmax.f32 %v359_v52, 0.0  ;;  %v675_v57 = vadd.f32 %v2724_v39, %v674_v53 }
  0xdc   : > { %v2008_v58 = vpop.f32.mrf.mxu1  ;;  %v363_v59 = vpop.f32.mrf.mxu0 }
  0xdd   : > { %v794_v1 = vmax.f32 %v675_v57, 0.0  ;;  %v364_v60 = vadd.f32 %v2724_v39, %v363_v59 }
  0xde   : > { %v679_v61 = vpop.f32.mrf.mxu1  ;;  %v1928_v62 = vpop.f32.mrf.mxu0 }
  0xdf   : > { %v2746_v63 = vmax.f32 %v478_v56, %v794_v1  ;;  %v479_v0 = vmax.f32 %v364_v60, 0.0  ;;  %v680_v2 = vadd.f32 %v2724_v39, %v679_v61 }
  0xe0   : > { %v2011_v3 = vpop.f32.mrf.mxu1  ;;  %v368_v4 = vpop.f32.mrf.mxu0 }
  0xe1   : > { %v795_v5 = vmax.f32 %v680_v2, 0.0  ;;  %v369_v6 = vadd.f32 %v2724_v39, %v368_v4 }
  0xe2   : > { %v684_v7 = vpop.f32.mrf.mxu1  ;;  %v1931_v8 = vpop.f32.mrf.mxu0 }
  0xe3   : > { %v2750_v9 = vmax.f32 %v479_v0, %v795_v5  ;;  %v480_v10 = vmax.f32 %v369_v6, 0.0  ;;  %v685_v11 = vadd.f32 %v2724_v39, %v684_v7 }
  0xe4   : > { %v2014_v12 = vpop.f32.mrf.mxu1  ;;  %v373_v13 = vpop.f32.mrf.mxu0 }
  0xe5   : > { %v796_v14 = vmax.f32 %v685_v11, 0.0  ;;  %v374_v15 = vadd.f32 %v2724_v39, %v373_v13 }
  0xe6   : > { %v689_v16 = vpop.f32.mrf.mxu1  ;;  %v1934_v17 = vpop.f32.mrf.mxu0 }
  0xe7   : > { %v2754_v18 = vmax.f32 %v480_v10, %v796_v14  ;;  %v481_v19 = vmax.f32 %v374_v15, 0.0  ;;  %v690_v20 = vadd.f32 %v2724_v39, %v689_v16 }
  0xe8   : > { %v2017_v21 = vpop.f32.mrf.mxu1  ;;  %v378_v22 = vpop.f32.mrf.mxu0 }
  0xe9   : > { %v797_v23 = vmax.f32 %v690_v20, 0.0  ;;  %v379_v24 = vadd.f32 %v2724_v39, %v378_v22 }
  0xea   : > { %v694_v25 = vpop.f32.mrf.mxu1  ;;  %v1937_v26 = vpop.f32.mrf.mxu0 }
  0xeb   : > { %v2758_v27 = vmax.f32 %v481_v19, %v797_v23  ;;  %v482_v28 = vmax.f32 %v379_v24, 0.0  ;;  %v695_v29 = vadd.f32 %v2724_v39, %v694_v25 }
  0xec   : > { %v2020_v30 = vpop.f32.mrf.mxu1  ;;  %v383_v31 = vpop.f32.mrf.mxu0 }
  0xed   : > { %v798_v32 = vmax.f32 %v695_v29, 0.0  ;;  %v384_v33 = vadd.f32 %v2724_v39, %v383_v31 }
  0xee   : > { %v699_v34 = vpop.f32.mrf.mxu1  ;;  %v1940_v35 = vpop.f32.mrf.mxu0 }
  0xef   : > { %v2762_v36 = vmax.f32 %v482_v28, %v798_v32  ;;  %v483_v37 = vmax.f32 %v384_v33, 0.0  ;;  %v700_v38 = vadd.f32 %v2724_v39, %v699_v34 }
  0xf0   : > { %v2023_v40 = vpop.f32.mrf.mxu1  ;;  %v388_v41 = vpop.f32.mrf.mxu0 }
  0xf1   : > { %v799_v42 = vmax.f32 %v700_v38, 0.0  ;;  %v389_v43 = vadd.f32 %v2724_v39, %v388_v41 }
  0xf2   : > { %v704_v44 = vpop.f32.mrf.mxu1  ;;  %v1943_v45 = vpop.f32.mrf.mxu0 }
  0xf3   : > { %v2766_v46 = vmax.f32 %v483_v37, %v799_v42  ;;  %v484_v47 = vmax.f32 %v389_v43, 0.0  ;;  %v705_v48 = vadd.f32 %v2724_v39, %v704_v44 }
  0xf4   : > { %v2026_v49 = vpop.f32.mrf.mxu1  ;;  %v393_v50 = vpop.f32.mrf.mxu0 }
  0xf5   : > { %v800_v51 = vmax.f32 %v705_v48, 0.0  ;;  %v394_v52 = vadd.f32 %v2724_v39, %v393_v50 }
  0xf6   : > { %v709_v53 = vpop.f32.mrf.mxu1  ;;  %v1946_v54 = vpop.f32.mrf.mxu0 }
  0xf7   : > { %v2770_v56 = vmax.f32 %v484_v47, %v800_v51  ;;  %v485_v57 = vmax.f32 %v394_v52, 0.0  ;;  %v710_v58 = vadd.f32 %v2724_v39, %v709_v53 }
  0xf8   : > { %v2029_v59 = vpop.f32.mrf.mxu1  ;;  %v398_v1 = vpop.f32.mrf.mxu0 }
  0xf9   : > { %v801_v60 = vmax.f32 %v710_v58, 0.0  ;;  %v399_v61 = vadd.f32 %v2724_v39, %v398_v1 }
  0xfa   : > { %v714_v62 = vpop.f32.mrf.mxu1  ;;  %v1949_v0 = vpop.f32.mrf.mxu0 }
  0xfb   : > { %v2774_v2 = vmax.f32 %v485_v57, %v801_v60  ;;  %v486_v3 = vmax.f32 %v399_v61, 0.0  ;;  %v715_v4 = vadd.f32 %v2724_v39, %v714_v62 }
  0xfc   : > { %v2032_v5 = vpop.f32.mrf.mxu1  ;;  %v403_v6 = vpop.f32.mrf.mxu0 }
  0xfd   : > { %v802_v7 = vmax.f32 %v715_v4, 0.0  ;;  %v404_v8 = vadd.f32 %v2724_v39, %v403_v6 }
  0xfe   : > { %v719_v10 = vpop.f32.mrf.mxu1  ;;  %v1952_v11 = vpop.f32.mrf.mxu0 }
  0xff   : > { %v2778_v12 = vmax.f32 %v486_v3, %v802_v7  ;;  %v487_v13 = vmax.f32 %v404_v8, 0.0  ;;  %v720_v14 = vadd.f32 %v2724_v39, %v719_v10 }
 0x100   : > { %v2035_v15 = vpop.f32.mrf.mxu1  ;;  %v408_v16 = vpop.f32.mrf.mxu0 }
 0x101   : > { %v803_v17 = vmax.f32 %v720_v14, 0.0  ;;  %v409_v19 = vadd.f32 %v2724_v39, %v408_v16 }
 0x102   : > { %v724_v20 = vpop.f32.mrf.mxu1  ;;  %v1955_v21 = vpop.f32.mrf.mxu0 }
 0x103   : > { %v2782_v22 = vmax.f32 %v487_v13, %v803_v17  ;;  %v488_v23 = vmax.f32 %v409_v19, 0.0  ;;  %v725_v24 = vadd.f32 %v2724_v39, %v724_v20 }
 0x104   : > { %v2038_v25 = vpop.f32.mrf.mxu1  ;;  %v413_v26 = vpop.f32.mrf.mxu0 }
 0x105   : > { %v804_v28 = vmax.f32 %v725_v24, 0.0  ;;  %v414_v29 = vadd.f32 %v2724_v39, %v413_v26 }
 0x106   : > { %v729_v30 = vpop.f32.mrf.mxu1  ;;  %v1958_v31 = vpop.f32.mrf.mxu0 }
 0x107   : > { %v2786_v32 = vmax.f32 %v488_v23, %v804_v28  ;;  %v489_v33 = vmax.f32 %v414_v29, 0.0  ;;  %v730_v34 = vadd.f32 %v2724_v39, %v729_v30 }
 0x108   : > { %v2041_v35 = vpop.f32.mrf.mxu1  ;;  %v418_v37 = vpop.f32.mrf.mxu0 }
 0x109   : > { %v805_v38 = vmax.f32 %v730_v34, 0.0  ;;  %v419_v40 = vadd.f32 %v2724_v39, %v418_v37 }
 0x10a   : > { %v734_v41 = vpop.f32.mrf.mxu1  ;;  %v1961_v42 = vpop.f32.mrf.mxu0 }
 0x10b   : > { %v2790_v43 = vmax.f32 %v489_v33, %v805_v38  ;;  %v490_v44 = vmax.f32 %v419_v40, 0.0  ;;  %v735_v45 = vadd.f32 %v2724_v39, %v734_v41 }
 0x10c   : > { %v2044_v47 = vpop.f32.mrf.mxu1  ;;  %v423_v48 = vpop.f32.mrf.mxu0 }
 0x10d   : > { %v806_v49 = vmax.f32 %v735_v45, 0.0  ;;  %v424_v50 = vadd.f32 %v2724_v39, %v423_v48 }
 0x10e   : > { %v739_v51 = vpop.f32.mrf.mxu1  ;;  %v1964_v52 = vpop.f32.mrf.mxu0 }
 0x10f   : > { %v2794_v53 = vmax.f32 %v490_v44, %v806_v49  ;;  %v491_v54 = vmax.f32 %v424_v50, 0.0  ;;  %v740_v57 = vadd.f32 %v2724_v39, %v739_v51 }
 0x110   : > { %v2047_v58 = vpop.f32.mrf.mxu1  ;;  %v428_v59 = vpop.f32.mrf.mxu0 }
 0x111   : > { %v807_v1 = vmax.f32 %v740_v57, 0.0  ;;  %v429_v60 = vadd.f32 %v2724_v39, %v428_v59 }
 0x112   : > { %v744_v61 = vpop.f32.mrf.mxu1  ;;  %v1967_v62 = vpop.f32.mrf.mxu0 }
 0x113   : > { %v2798_v0 = vmax.f32 %v491_v54, %v807_v1  ;;  %v492_v3 = vmax.f32 %v429_v60, 0.0  ;;  %v745_v4 = vadd.f32 %v2724_v39, %v744_v61 }
 0x114   : > { %v2050_v5 = vpop.f32.mrf.mxu1  ;;  %v433_v6 = vpop.f32.mrf.mxu0 }
 0x115   : > { %v808_v7 = vmax.f32 %v745_v4, 0.0  ;;  %v434_v8 = vadd.f32 %v2724_v39, %v433_v6 }
 0x116   : > { %v749_v10 = vpop.f32.mrf.mxu1  ;;  %v1970_v11 = vpop.f32.mrf.mxu0 }
 0x117   : > { %v2802_v13 = vmax.f32 %v492_v3, %v808_v7  ;;  %v493_v14 = vmax.f32 %v434_v8, 0.0  ;;  %v750_v15 = vadd.f32 %v2724_v39, %v749_v10 }
 0x118   : > { %v2053_v16 = vpop.f32.mrf.mxu1  ;;  %v438_v17 = vpop.f32.mrf.mxu0 }
 0x119   : > { %v809_v19 = vmax.f32 %v750_v15, 0.0  ;;  %v439_v20 = vadd.f32 %v2724_v39, %v438_v17 }
 0x11a   : > { %v754_v21 = vpop.f32.mrf.mxu1  ;;  %v1973_v23 = vpop.f32.mrf.mxu0 }
 0x11b   : > { %v2806_v24 = vmax.f32 %v493_v14, %v809_v19  ;;  %v494_v25 = vmax.f32 %v439_v20, 0.0  ;;  %v755_v26 = vadd.f32 %v2724_v39, %v754_v21 }
 0x11c   : > { %v2056_v28 = vpop.f32.mrf.mxu1  ;;  %v443_v29 = vpop.f32.mrf.mxu0 }
 0x11d   : > { %v810_v30 = vmax.f32 %v755_v26, 0.0  ;;  %v444_v31 = vadd.f32 %v2724_v39, %v443_v29 }
 0x11e   : > { %v759_v33 = vpop.f32.mrf.mxu1  ;;  %v1976_v34 = vpop.f32.mrf.mxu0 }
 0x11f   : > { %v2810_v35 = vmax.f32 %v494_v25, %v810_v30  ;;  %v495_v37 = vmax.f32 %v444_v31, 0.0  ;;  %v760_v38 = vadd.f32 %v2724_v39, %v759_v33 }
 0x120   : > { %v2059_v40 = vpop.f32.mrf.mxu1  ;;  %v448_v41 = vpop.f32.mrf.mxu0 }
 0x121   : > { %v811_v42 = vmax.f32 %v760_v38, 0.0  ;;  %v449_v44 = vadd.f32 %v2724_v39, %v448_v41 }
 0x122   : > { %v764_v45 = vpop.f32.mrf.mxu1  ;;  %v1979_v47 = vpop.f32.mrf.mxu0 }
 0x123   : > { %v2814_v48 = vmax.f32 %v495_v37, %v811_v42  ;;  %v496_v49 = vmax.f32 %v449_v44, 0.0  ;;  %v765_v50 = vadd.f32 %v2724_v39, %v764_v45 }
 0x124   : > { %v2062_v51 = vpop.f32.mrf.mxu1  ;;  %v453_v52 = vpop.f32.mrf.mxu0 }
 0x125   : > { %v812_v54 = vmax.f32 %v765_v50, 0.0  ;;  %v454_v57 = vadd.f32 %v2724_v39, %v453_v52 }
 0x126   : > { %v769_v58 = vpop.f32.mrf.mxu1  ;;  %v1982_v59 = vpop.f32.mrf.mxu0 }
 0x127   : > { %v2818_v1 = vmax.f32 %v496_v49, %v812_v54  ;;  %v497_v60 = vmax.f32 %v454_v57, 0.0  ;;  %v770_v61 = vadd.f32 %v2724_v39, %v769_v58 }
 0x128   : > { %v2065_v62 = vpop.f32.mrf.mxu1  ;;  %v458_v3 = vpop.f32.mrf.mxu0 }
 0x129   : > { %v813_v4 = vmax.f32 %v770_v61, 0.0  ;;  %v459_v5 = vadd.f32 %v2724_v39, %v458_v3 }
 0x12a   : > { %v774_v6 = vpop.f32.mrf.mxu1  ;;  %v1985_v7 = vpop.f32.mrf.mxu0 }
 0x12b   : > { %v2822_v8 = vmax.f32 %v497_v60, %v813_v4  ;;  %v498_v10 = vmax.f32 %v459_v5, 0.0  ;;  %v775_v11 = vadd.f32 %v2724_v39, %v774_v6 }
 0x12c   : > { %v2068_v14 = vpop.f32.mrf.mxu1  ;;  %v463_v15 = vpop.f32.mrf.mxu0 }
 0x12d   : > { %v814_v16 = vmax.f32 %v775_v11, 0.0  ;;  %v464_v17 = vadd.f32 %v2724_v39, %v463_v15 }
 0x12e   : > { %v779_v19 = vpop.f32.mrf.mxu1  ;;  %v1988_v20 = vpop.f32.mrf.mxu0 }
 0x12f   : > { %v2826_v21 = vmax.f32 %v498_v10, %v814_v16  ;;  %v499_v23 = vmax.f32 %v464_v17, 0.0  ;;  %v780_v25 = vadd.f32 %v2724_v39, %v779_v19 }
 0x130   : > { %v2071_v26 = vpop.f32.mrf.mxu1  ;;  %v468_v28 = vpop.f32.mrf.mxu0 }
 0x131   : > { %v815_v29 = vmax.f32 %v780_v25, 0.0  ;;  %v469_v30 = vadd.f32 %v2724_v39, %v468_v28 }
 0x132   : > { %v784_v31 = vpop.f32.mrf.mxu1  ;;  %v1991_v33 = vpop.f32.mrf.mxu0 }
 0x133   : > { %v2830_v34 = vmax.f32 %v499_v23, %v815_v29  ;;  %v500_v37 = vmax.f32 %v469_v30, 0.0  ;;  %v785_v38 = vadd.f32 %v2724_v39, %v784_v31 }
 0x134   : > { %v2074_v40 = vpop.f32.mrf.mxu1  ;;  %v473_v41 = vpop.f32.mrf.mxu0 }
 0x135   : > { %v816_v42 = vmax.f32 %v785_v38, 0.0  ;;  %v474_v44 = vadd.f32 %v2724_v39, %v473_v41 }
 0x136   : > { %v789_v45 = vpop.f32.mrf.mxu1  ;;  %v1994_v47 = vpop.f32.mrf.mxu0 }
 0x137   : > { %v2834_v49 = vmax.f32 %v500_v37, %v816_v42  ;;  %v501_v50 = vmax.f32 %v474_v44, 0.0  ;;  %v790_v51 = vadd.f32 %v2724_v39, %v789_v45 }
 0x138   : > { %v2077_v52 = vpop.f32.mrf.mxu1  ;;  %v1010_v54 = vpop.f32.mrf.mxu0 }
 0x139   : > { %v817_v57 = vmax.f32 %v790_v51, 0.0  ;;  %v1011_v58 = vadd.f32 %v2724_v39, %v1010_v54 }
 0x13a   : > { %v1351_v59 = vpop.f32.mrf.mxu1  ;;  %v2088_v60 = vpop.f32.mrf.mxu0 }
 0x13b   : > { %v2839_v61 = vmax.f32 %v501_v50, %v817_v57  ;;  %v1134_v62 = vmax.f32 %v1011_v58, 0.0  ;;  %v1352_v3 = vadd.f32 %v2724_v39, %v1351_v59 }
 0x13c   : > { %v2171_v4 = vpop.f32.mrf.mxu1  ;;  %v1015_v5 = vpop.f32.mrf.mxu0 }
 0x13d   : > { %v1159_v6 = vmax.f32 %v2742_v55, %v1134_v62  ;;  %v1475_v7 = vmax.f32 %v1352_v3, 0.0  ;;  %v1016_v10 = vadd.f32 %v2724_v39, %v1015_v5 }
 0x13e   : > { %v1356_v11 = vpop.f32.mrf.mxu1  ;;  %v2091_v14 = vpop.f32.mrf.mxu0 }
 0x13f   : > { %v1500_v15 = vmax.f32 %v1159_v6, %v1475_v7  ;;  %v1135_v16 = vmax.f32 %v1016_v10, 0.0  ;;  %v1357_v17 = vadd.f32 %v2724_v39, %v1356_v11 }
 0x140   : > { %v2174_v19 = vpop.f32.mrf.mxu1  ;;  %v1020_v20 = vpop.f32.mrf.mxu0 }
 0x141   : > { %1526 = vst.msk [vmem:[%s2847_s4] sm:$0xff] %vm1525_vm3, %v1500_v15  ;;  %v1160_v55 = vmax.f32 %v2746_v63, %v1135_v16  ;;  %v1476_v23 = vmax.f32 %v1357_v17, 0.0  ;;  %v1021_v25 = vadd.f32 %v2724_v39, %v1020_v20 }
 0x142   : > { %v1361_v26 = vpop.f32.mrf.mxu1  ;;  %v2094_v28 = vpop.f32.mrf.mxu0 }
 0x143   : > { %v1501_v29 = vmax.f32 %v1160_v55, %v1476_v23  ;;  %v1136_v30 = vmax.f32 %v1021_v25, 0.0  ;;  %v1362_v31 = vadd.f32 %v2724_v39, %v1361_v26 }
 0x144   : > { %v2177_v33 = vpop.f32.mrf.mxu1  ;;  %v1025_v37 = vpop.f32.mrf.mxu0 }
 0x145   : > { %1527 = vst.msk [vmem:[%s2847_s4 + $0x8] sm:$0xff] %vm1525_vm3, %v1501_v29  ;;  %v1161_v38 = vmax.f32 %v2750_v9, %v1136_v30  ;;  %v1477_v40 = vmax.f32 %v1362_v31, 0.0  ;;  %v1026_v41 = vadd.f32 %v2724_v39, %v1025_v37 }
 0x146   : > { %v1366_v63 = vpop.f32.mrf.mxu1  ;;  %v2097_v42 = vpop.f32.mrf.mxu0 }
 0x147   : > { %v1502_v44 = vmax.f32 %v1161_v38, %v1477_v40  ;;  %v1137_v45 = vmax.f32 %v1026_v41, 0.0  ;;  %v1367_v47 = vadd.f32 %v2724_v39, %v1366_v63 }
 0x148   : > { %v2180_v50 = vpop.f32.mrf.mxu1  ;;  %v1030_v51 = vpop.f32.mrf.mxu0 }
 0x149   : > { %1528 = vst.msk [vmem:[%s2847_s4 + $0x10] sm:$0xff] %vm1525_vm3, %v1502_v44  ;;  %v1162_v52 = vmax.f32 %v2754_v18, %v1137_v45  ;;  %v1478_v54 = vmax.f32 %v1367_v47, 0.0  ;;  %v1031_v57 = vadd.f32 %v2724_v39, %v1030_v51 }
 0x14a   : > { %v1371_v9 = vpop.f32.mrf.mxu1  ;;  %v2100_v58 = vpop.f32.mrf.mxu0 }
 0x14b   : > { %v1503_v59 = vmax.f32 %v1162_v52, %v1478_v54  ;;  %v1138_v60 = vmax.f32 %v1031_v57, 0.0  ;;  %v1372_v62 = vadd.f32 %v2724_v39, %v1371_v9 }
 0x14c   : > { %v2183_v3 = vpop.f32.mrf.mxu1  ;;  %v1035_v4 = vpop.f32.mrf.mxu0 }
 0x14d   : > { %1529 = vst.msk [vmem:[%s2847_s4 + $0x18] sm:$0xff] %vm1525_vm3, %v1503_v59  ;;  %v1163_v5 = vmax.f32 %v2758_v27, %v1138_v60  ;;  %v1479_v6 = vmax.f32 %v1372_v62, 0.0  ;;  %v1036_v7 = vadd.f32 %v2724_v39, %v1035_v4 }
 0x14e   : > { %v1376_v18 = vpop.f32.mrf.mxu1  ;;  %v2103_v10 = vpop.f32.mrf.mxu0 }
 0x14f   : > { %v1504_v11 = vmax.f32 %v1163_v5, %v1479_v6  ;;  %v1139_v14 = vmax.f32 %v1036_v7, 0.0  ;;  %v1377_v15 = vadd.f32 %v2724_v39, %v1376_v18 }
 0x150   : > { %v2186_v16 = vpop.f32.mrf.mxu1  ;;  %v1040_v17 = vpop.f32.mrf.mxu0 }
 0x151   : > { %1530 = vst.msk [vmem:[%s2847_s4 + $0x20] sm:$0xff] %vm1525_vm3, %v1504_v11  ;;  %v1164_v19 = vmax.f32 %v2762_v36, %v1139_v14  ;;  %v1480_v20 = vmax.f32 %v1377_v15, 0.0  ;;  %v1041_v55 = vadd.f32 %v2724_v39, %v1040_v17 }
 0x152   : > { %v1381_v27 = vpop.f32.mrf.mxu1  ;;  %v2106_v23 = vpop.f32.mrf.mxu0 }
 0x153   : > { %v1505_v25 = vmax.f32 %v1164_v19, %v1480_v20  ;;  %v1140_v26 = vmax.f32 %v1041_v55, 0.0  ;;  %v1382_v28 = vadd.f32 %v2724_v39, %v1381_v27 }
 0x154   : > { %v2189_v29 = vpop.f32.mrf.mxu1  ;;  %v1045_v30 = vpop.f32.mrf.mxu0 }
 0x155   : > { %1531 = vst.msk [vmem:[%s2847_s4 + $0x28] sm:$0xff] %vm1525_vm3, %v1505_v25  ;;  %v1165_v31 = vmax.f32 %v2766_v46, %v1140_v26  ;;  %v1481_v33 = vmax.f32 %v1382_v28, 0.0  ;;  %v1046_v37 = vadd.f32 %v2724_v39, %v1045_v30 }
 0x156   : > { %v1386_v36 = vpop.f32.mrf.mxu1  ;;  %v2109_v38 = vpop.f32.mrf.mxu0 }
 0x157   : > { %v1506_v40 = vmax.f32 %v1165_v31, %v1481_v33  ;;  %v1141_v41 = vmax.f32 %v1046_v37, 0.0  ;;  %v1387_v63 = vadd.f32 %v2724_v39, %v1386_v36 }
 0x158   : > { %v2192_v42 = vpop.f32.mrf.mxu1  ;;  %v1050_v44 = vpop.f32.mrf.mxu0 }
 0x159   : > { %1532 = vst.msk [vmem:[%s2847_s4 + $0x30] sm:$0xff] %vm1525_vm3, %v1506_v40  ;;  %v1166_v45 = vmax.f32 %v2770_v56, %v1141_v41  ;;  %v1482_v47 = vmax.f32 %v1387_v63, 0.0  ;;  %v1051_v50 = vadd.f32 %v2724_v39, %v1050_v44 }
 0x15a   : > { %v1391_v46 = vpop.f32.mrf.mxu1  ;;  %v2112_v51 = vpop.f32.mrf.mxu0 }
 0x15b   : > { %v1507_v52 = vmax.f32 %v1166_v45, %v1482_v47  ;;  %v1142_v54 = vmax.f32 %v1051_v50, 0.0  ;;  %v1392_v57 = vadd.f32 %v2724_v39, %v1391_v46 }
 0x15c   : > { %v2195_v9 = vpop.f32.mrf.mxu1  ;;  %v1055_v58 = vpop.f32.mrf.mxu0 }
 0x15d   : > { %1533 = vst.msk [vmem:[%s2847_s4 + $0x38] sm:$0xff] %vm1525_vm3, %v1507_v52  ;;  %v1167_v59 = vmax.f32 %v2774_v2, %v1142_v54  ;;  %v1483_v60 = vmax.f32 %v1392_v57, 0.0  ;;  %v1056_v62 = vadd.f32 %v2724_v39, %v1055_v58 }
 0x15e   : > { %v1396_v56 = vpop.f32.mrf.mxu1  ;;  %v2115_v3 = vpop.f32.mrf.mxu0 }
 0x15f   : > { %v1508_v4 = vmax.f32 %v1167_v59, %v1483_v60  ;;  %v1143_v5 = vmax.f32 %v1056_v62, 0.0  ;;  %v1397_v6 = vadd.f32 %v2724_v39, %v1396_v56 }
 0x160   : > { %v2198_v7 = vpop.f32.mrf.mxu1  ;;  %v1060_v18 = vpop.f32.mrf.mxu0 }
 0x161   : > { %1534 = vst.msk [vmem:[%s2847_s4 + $0x40] sm:$0xff] %vm1525_vm3, %v1508_v4  ;;  %v1168_v10 = vmax.f32 %v2778_v12, %v1143_v5  ;;  %v1484_v11 = vmax.f32 %v1397_v6, 0.0  ;;  %v1061_v14 = vadd.f32 %v2724_v39, %v1060_v18 }
 0x162   : > { %v1401_v2 = vpop.f32.mrf.mxu1  ;;  %v2118_v15 = vpop.f32.mrf.mxu0 }
 0x163   : > { %v1509_v16 = vmax.f32 %v1168_v10, %v1484_v11  ;;  %v1144_v17 = vmax.f32 %v1061_v14, 0.0  ;;  %v1402_v19 = vadd.f32 %v2724_v39, %v1401_v2 }
 0x164   : > { %v2201_v20 = vpop.f32.mrf.mxu1  ;;  %v1065_v55 = vpop.f32.mrf.mxu0 }
 0x165   : > { %1535 = vst.msk [vmem:[%s2847_s4 + $0x48] sm:$0xff] %vm1525_vm3, %v1509_v16  ;;  %v1169_v27 = vmax.f32 %v2782_v22, %v1144_v17  ;;  %v1485_v23 = vmax.f32 %v1402_v19, 0.0  ;;  %v1066_v25 = vadd.f32 %v2724_v39, %v1065_v55 }
 0x166   : > { %v1406_v12 = vpop.f32.mrf.mxu1  ;;  %v2121_v26 = vpop.f32.mrf.mxu0 }
 0x167   : > { %v1510_v28 = vmax.f32 %v1169_v27, %v1485_v23  ;;  %v1145_v29 = vmax.f32 %v1066_v25, 0.0  ;;  %v1407_v30 = vadd.f32 %v2724_v39, %v1406_v12 }
 0x168   : > { %v2204_v31 = vpop.f32.mrf.mxu1  ;;  %v1070_v33 = vpop.f32.mrf.mxu0 }
 0x169   : > { %1536 = vst.msk [vmem:[%s2847_s4 + $0x50] sm:$0xff] %vm1525_vm3, %v1510_v28  ;;  %v1170_v37 = vmax.f32 %v2786_v32, %v1145_v29  ;;  %v1486_v36 = vmax.f32 %v1407_v30, 0.0  ;;  %v1071_v38 = vadd.f32 %v2724_v39, %v1070_v33 }
 0x16a   : > { %v1411_v22 = vpop.f32.mrf.mxu1  ;;  %v2124_v40 = vpop.f32.mrf.mxu0 }
 0x16b   : > { %v1511_v41 = vmax.f32 %v1170_v37, %v1486_v36  ;;  %v1146_v63 = vmax.f32 %v1071_v38, 0.0  ;;  %v1412_v42 = vadd.f32 %v2724_v39, %v1411_v22 }
 0x16c   : > { %v2207_v44 = vpop.f32.mrf.mxu1  ;;  %v1075_v45 = vpop.f32.mrf.mxu0 }
 0x16d   : > { %1537 = vst.msk [vmem:[%s2847_s4 + $0x58] sm:$0xff] %vm1525_vm3, %v1511_v41  ;;  %v1171_v47 = vmax.f32 %v2790_v43, %v1146_v63  ;;  %v1487_v50 = vmax.f32 %v1412_v42, 0.0  ;;  %v1076_v46 = vadd.f32 %v2724_v39, %v1075_v45 }
 0x16e   : > { %v1416_v32 = vpop.f32.mrf.mxu1  ;;  %v2127_v51 = vpop.f32.mrf.mxu0 }
 0x16f   : > { %v1512_v52 = vmax.f32 %v1171_v47, %v1487_v50  ;;  %v1147_v54 = vmax.f32 %v1076_v46, 0.0  ;;  %v1417_v57 = vadd.f32 %v2724_v39, %v1416_v32 }
 0x170   : > { %v2210_v9 = vpop.f32.mrf.mxu1  ;;  %v1080_v58 = vpop.f32.mrf.mxu0 }
 0x171   : > { %1538 = vst.msk [vmem:[%s2847_s4 + $0x60] sm:$0xff] %vm1525_vm3, %v1512_v52  ;;  %v1172_v59 = vmax.f32 %v2794_v53, %v1147_v54  ;;  %v1488_v60 = vmax.f32 %v1417_v57, 0.0  ;;  %v1081_v62 = vadd.f32 %v2724_v39, %v1080_v58 }
 0x172   : > { %v1421_v43 = vpop.f32.mrf.mxu1  ;;  %v2130_v56 = vpop.f32.mrf.mxu0 }
 0x173   : > { %v1513_v3 = vmax.f32 %v1172_v59, %v1488_v60  ;;  %v1148_v4 = vmax.f32 %v1081_v62, 0.0  ;;  %v1422_v5 = vadd.f32 %v2724_v39, %v1421_v43 }
 0x174   : > { %v2213_v6 = vpop.f32.mrf.mxu1  ;;  %v1085_v7 = vpop.f32.mrf.mxu0 }
 0x175   : > { %1539 = vst.msk [vmem:[%s2847_s4 + $0x68] sm:$0xff] %vm1525_vm3, %v1513_v3  ;;  %v1173_v18 = vmax.f32 %v2798_v0, %v1148_v4  ;;  %v1489_v10 = vmax.f32 %v1422_v5, 0.0  ;;  %v1086_v11 = vadd.f32 %v2724_v39, %v1085_v7 }
 0x176   : > { %v1426_v53 = vpop.f32.mrf.mxu1  ;;  %v2133_v14 = vpop.f32.mrf.mxu0 }
 0x177   : > { %v1514_v2 = vmax.f32 %v1173_v18, %v1489_v10  ;;  %v1149_v15 = vmax.f32 %v1086_v11, 0.0  ;;  %v1427_v16 = vadd.f32 %v2724_v39, %v1426_v53 }
 0x178   : > { %v2216_v17 = vpop.f32.mrf.mxu1  ;;  %v1090_v19 = vpop.f32.mrf.mxu0 }
 0x179   : > { %1540 = vst.msk [vmem:[%s2847_s4 + $0x70] sm:$0xff] %vm1525_vm3, %v1514_v2  ;;  %v1174_v20 = vmax.f32 %v2802_v13, %v1149_v15  ;;  %v1490_v55 = vmax.f32 %v1427_v16, 0.0  ;;  %v1091_v27 = vadd.f32 %v2724_v39, %v1090_v19 }
 0x17a   : > { %v1431_v0 = vpop.f32.mrf.mxu1  ;;  %v2136_v23 = vpop.f32.mrf.mxu0 }
 0x17b   : > { %v1515_v25 = vmax.f32 %v1174_v20, %v1490_v55  ;;  %v1150_v12 = vmax.f32 %v1091_v27, 0.0  ;;  %v1432_v26 = vadd.f32 %v2724_v39, %v1431_v0 }
 0x17c   : > { %v2219_v28 = vpop.f32.mrf.mxu1  ;;  %v1095_v29 = vpop.f32.mrf.mxu0 }
 0x17d   : > { %1541 = vst.msk [vmem:[%s2847_s4 + $0x78] sm:$0xff] %vm1525_vm3, %v1515_v25  ;;  %v1175_v30 = vmax.f32 %v2806_v24, %v1150_v12  ;;  %v1491_v31 = vmax.f32 %v1432_v26, 0.0  ;;  %v1096_v33 = vadd.f32 %v2724_v39, %v1095_v29 }
 0x17e   : > { %v1436_v13 = vpop.f32.mrf.mxu1  ;;  %v2139_v37 = vpop.f32.mrf.mxu0 }
 0x17f   : > { %v1516_v36 = vmax.f32 %v1175_v30, %v1491_v31  ;;  %v1151_v38 = vmax.f32 %v1096_v33, 0.0  ;;  %v1437_v22 = vadd.f32 %v2724_v39, %v1436_v13 }
 0x180   : > { %v2222_v40 = vpop.f32.mrf.mxu1  ;;  %v1100_v41 = vpop.f32.mrf.mxu0 }
 0x181   : > { %1542 = vst.msk [vmem:[%s2847_s4 + $0x80] sm:$0xff] %vm1525_vm3, %v1516_v36  ;;  %v1176_v63 = vmax.f32 %v2810_v35, %v1151_v38  ;;  %v1492_v42 = vmax.f32 %v1437_v22, 0.0  ;;  %v1101_v44 = vadd.f32 %v2724_v39, %v1100_v41 }
 0x182   : > { %v1441_v24 = vpop.f32.mrf.mxu1  ;;  %v2142_v45 = vpop.f32.mrf.mxu0 }
 0x183   : > { %v1517_v47 = vmax.f32 %v1176_v63, %v1492_v42  ;;  %v1152_v50 = vmax.f32 %v1101_v44, 0.0  ;;  %v1442_v46 = vadd.f32 %v2724_v39, %v1441_v24 }
 0x184   : > { %v2225_v32 = vpop.f32.mrf.mxu1  ;;  %v1105_v51 = vpop.f32.mrf.mxu0 }
 0x185   : > { %1543 = vst.msk [vmem:[%s2847_s4 + $0x88] sm:$0xff] %vm1525_vm3, %v1517_v47  ;;  %v1177_v52 = vmax.f32 %v2814_v48, %v1152_v50  ;;  %v1493_v54 = vmax.f32 %v1442_v46, 0.0  ;;  %v1106_v57 = vadd.f32 %v2724_v39, %v1105_v51 }
 0x186   : > { %v1446_v35 = vpop.f32.mrf.mxu1  ;;  %v2145_v9 = vpop.f32.mrf.mxu0 }
 0x187   : > { %v1518_v58 = vmax.f32 %v1177_v52, %v1493_v54  ;;  %v1153_v59 = vmax.f32 %v1106_v57, 0.0  ;;  %v1447_v60 = vadd.f32 %v2724_v39, %v1446_v35 }
 0x188   : > { %v2228_v62 = vpop.f32.mrf.mxu1  ;;  %v1110_v43 = vpop.f32.mrf.mxu0 }
 0x189   : > { %1544 = vst.msk [vmem:[%s2847_s4 + $0x90] sm:$0xff] %vm1525_vm3, %v1518_v58  ;;  %v1178_v56 = vmax.f32 %v2818_v1, %v1153_v59  ;;  %v1494_v3 = vmax.f32 %v1447_v60, 0.0  ;;  %v1111_v4 = vadd.f32 %v2724_v39, %v1110_v43 }
 0x18a   : > { %v1451_v48 = vpop.f32.mrf.mxu1  ;;  %v2148_v5 = vpop.f32.mrf.mxu0 }
 0x18b   : > { %v1519_v6 = vmax.f32 %v1178_v56, %v1494_v3  ;;  %v1154_v7 = vmax.f32 %v1111_v4, 0.0  ;;  %v1452_v18 = vadd.f32 %v2724_v39, %v1451_v48 }
 0x18c   : > { %v2231_v10 = vpop.f32.mrf.mxu1  ;;  %v1115_v11 = vpop.f32.mrf.mxu0 }
 0x18d   : > { %1545 = vst.msk [vmem:[%s2847_s4 + $0x98] sm:$0xff] %vm1525_vm3, %v1519_v6  ;;  %v1179_v53 = vmax.f32 %v2822_v8, %v1154_v7  ;;  %v1495_v14 = vmax.f32 %v1452_v18, 0.0  ;;  %v1116_v2 = vadd.f32 %v2724_v39, %v1115_v11 }
 0x18e   : > { %v1456_v1 = vpop.f32.mrf.mxu1  ;;  %v2151_v15 = vpop.f32.mrf.mxu0 }
 0x18f   : > { %v1520_v16 = vmax.f32 %v1179_v53, %v1495_v14  ;;  %v1155_v17 = vmax.f32 %v1116_v2, 0.0  ;;  %v1457_v19 = vadd.f32 %v2724_v39, %v1456_v1 }
 0x190   : > { %v2234_v20 = vpop.f32.mrf.mxu1  ;;  %v1120_v55 = vpop.f32.mrf.mxu0 }
 0x191   : > { %1546 = vst.msk [vmem:[%s2847_s4 + $0xa0] sm:$0xff] %vm1525_vm3, %v1520_v16  ;;  %v1180_v27 = vmax.f32 %v2826_v21, %v1155_v17  ;;  %v1496_v0 = vmax.f32 %v1457_v19, 0.0  ;;  %v1121_v23 = vadd.f32 %v2724_v39, %v1120_v55 }
 0x192   : > { %v1461_v8 = vpop.f32.mrf.mxu1  ;;  %v2154_v25 = vpop.f32.mrf.mxu0 }
 0x193   : > { %v1521_v12 = vmax.f32 %v1180_v27, %v1496_v0  ;;  %v1156_v26 = vmax.f32 %v1121_v23, 0.0  ;;  %v1462_v28 = vadd.f32 %v2724_v39, %v1461_v8 }
 0x194   : > { %v2237_v29 = vpop.f32.mrf.mxu1  ;;  %v1125_v30 = vpop.f32.mrf.mxu0 }
 0x195   : > { %1547 = vst.msk [vmem:[%s2847_s4 + $0xa8] sm:$0xff] %vm1525_vm3, %v1521_v12  ;;  %v1181_v31 = vmax.f32 %v2830_v34, %v1156_v26  ;;  %v1497_v33 = vmax.f32 %v1462_v28, 0.0  ;;  %v1126_v13 = vadd.f32 %v2724_v39, %v1125_v30 }
 0x196   : > { %v1466_v21 = vpop.f32.mrf.mxu1  ;;  %v2157_v37 = vpop.f32.mrf.mxu0 }
 0x197   : > { %v1522_v36 = vmax.f32 %v1181_v31, %v1497_v33  ;;  %v1157_v38 = vmax.f32 %v1126_v13, 0.0  ;;  %v1467_v22 = vadd.f32 %v2724_v39, %v1466_v21 }
 0x198   : > { %v2240_v40 = vpop.f32.mrf.mxu1  ;;  %v1130_v41 = vpop.f32.mrf.mxu0 }
 0x199   : > { %1548 = vst.msk [vmem:[%s2847_s4 + $0xb0] sm:$0xff] %vm1525_vm3, %v1522_v36  ;;  %v1182_v63 = vmax.f32 %v2834_v49, %v1157_v38  ;;  %v1498_v42 = vmax.f32 %v1467_v22, 0.0  ;;  %v1131_v34 = vadd.f32 %v2724_v39, %v1130_v41 }
 0x19a   : > { %v1471_v44 = vpop.f32.mrf.mxu1  ;;  %v2160_v24 = vpop.f32.mrf.mxu0 }
 0x19b   : > { %v1523_v45 = vmax.f32 %v1182_v63, %v1498_v42  ;;  %v1158_v47 = vmax.f32 %v1131_v34, 0.0  ;;  %v1472_v50 = vadd.f32 %v2724_v39, %v1471_v44 }
 0x19c   : > { %v2243_v46 = vpop.f32.mrf.mxu1 }
 0x19d   : > { %1549 = vst.msk [vmem:[%s2847_s4 + $0xb8] sm:$0xff] %vm1525_vm3, %v1523_v45  ;;  %v1183_v32 = vmax.f32 %v2839_v61, %v1158_v47  ;;  %v1499_v51 = vmax.f32 %v1472_v50, 0.0 }
 0x19f   : > { %v1524_v52 = vmax.f32 %v1183_v32, %v1499_v51 }
 0x1a1   : > { %1551 = vst.msk [vmem:[%s2847_s4 + $0xc0] sm:$0xf] %vm1550_vm4, %v1524_v52 }
 0x1a2 PF: > { %s13_s12 = sadd.s32 1, %s2262_s12  }
 0x1a3   : > { %p10_p4 = scmp.ge.s32.totalorder %s13_s12, 4  }
 0x1a5   :  { %12 = sbr.rel (!%p10_p4) target bundleno = 1 (0x1), region = 65 }

// kernel: net_forward.4
= control target key start
LH: loop header
LB: loop body
LE: loop exit
PB: predicated region body
PF: predicated region fallthrough
CT: control target
= control target key end

     0   :  { %s810_s12 = smov 0   ;;  %s1148_s0 = inlined_call_operand.vmem [shape: f32[2,4,25,150], index: 0, kind: input, shape index: {}]   ;;  %s1149_s1 = inlined_call_operand.vmem [shape: f32[150,16], index: 1, kind: input, shape index: {}]   ;;  %s1150_s2 = inlined_call_operand.vmem [shape: f32[1,16], index: 2, kind: input, shape index: {}]   ;;  %s1151_s3 = inlined_call_operand.vmem [shape: f32[2,25,16], index: 3, kind: output, shape index: {}]  }
   0x1 LB: > { %s714_s13 = sadd.s32 4294967295, %s787_s12   ;;  %p718_p0 = scmp.ge.s32.totalorder %s787_s12, 1  ;;  %s787_s12 = sphi %s810_s12, %s13_s12  }
   0x2   : > { %p137_p1 = scmp.lt.s32.totalorder %s787_s12, 3 }
   0x4   : > { %p138_p2 = pnand %p718_p0, %p137_p1 }
   0x5   : > { %p161_p3 = scmp.lt.s32.totalorder (!%p138_p2), %s714_s13, 1 }
   0x6   : > { %141 = sbr.rel (%p138_p2) target bundleno = 311 (0x137), region = 32 }
   0xb   : > { %v821_v0 = vld [vmem:[%s1149_s1 + $0x78] sm:$0xff]  ;;  %v789_v1 = vmov 0.0   ;;  %v828_v2 = vld [vmem:[%s1149_s1 + $0x70] sm:$0xff]  ;;  %v837_v3 = vld [vmem:[%s1149_s1 + $0x68] sm:$0xff]  ;;  %s1153_s13 = smov (!%p161_p3, %s714_s13), 1  ;;  %vm218_vm0 = vcmask 1045504  }
   0xc   : > { %222 = vmatprep.subr.mxu0 %v789_v1  ;;  %332 = vmatprep.subr.mxu1 %v789_v1  ;;  %v846_v4 = vld [vmem:[%s1149_s1 + $0x60] sm:$0xff]  ;;  %v855_v5 = vld [vmem:[%s1149_s1 + $0x58] sm:$0xff]  ;;  %v864_v6 = vld [vmem:[%s1149_s1 + $0x50] sm:$0xff]  ;;  %s770_s21 = sshll.u32 %s1153_s13, 8  ;;  %vm205_vm1 = vcmask 179200   ;;  %s771_s6 = sshll.u32 %s1153_s13, 5 }
   0xd   : > { %223 = vmatpush1.msra.mxu0 %v821_v0  ;;  %333 = vmatpush1.msra.mxu1 %v821_v0  ;;  %v873_v7 = vld [vmem:[%s1149_s1 + $0x48] sm:$0xff]  ;;  %v882_v8 = vld [vmem:[%s1149_s1 + $0x40] sm:$0xff]  ;;  %v891_v9 = vld [vmem:[%s1149_s1 + $0x38] sm:$0xff]  ;;  %s977_s26 = scalar_lea.vmem %s1148_s0, %s770_s21  ;;  %vm653_vm2 = vcmask 130048   ;;  %s1136_s9 = scalar_lea.vmem %s1151_s3, %s771_s6  ;;  %vm657_vm3 = vcmask 122880  }
   0xe   : > { %224 = vmatprep.subr.mxu0 %v789_v1  ;;  %334 = vmatprep.subr.mxu1 %v789_v1  ;;  %v900_v10 = vld [vmem:[%s1149_s1 + $0x30] sm:$0xff]  ;;  %v909_v11 = vld [vmem:[%s1149_s1 + $0x28] sm:$0xff]  ;;  %v918_v12 = vld [vmem:[%s1149_s1 + $0x20] sm:$0xff] }
   0xf   : > { %225 = vmatpush1.msra.mxu0 %v828_v2  ;;  %335 = vmatpush1.msra.mxu1 %v828_v2  ;;  %v929_v13 = vld [vmem:[%s1149_s1 + $0x18] sm:$0xff]  ;;  %v938_v14 = vld [vmem:[%s1149_s1 + $0x10] sm:$0xff]  ;;  %v951_v15 = vld [vmem:[%s1149_s1 + $0x8] sm:$0xff] }
  0x10   : > { %226 = vmatprep.subr.mxu0 %v789_v1  ;;  %336 = vmatprep.subr.mxu1 %v789_v1  ;;  %v960_v16 = vld [vmem:[%s1149_s1] sm:$0xff]  ;;  %v970_v17 = vld [vmem:[%s1149_s1 + $0x90] sm:$0x3f]  ;;  %v984_v18 = vld [vmem:[%s1149_s1 + $0x88] sm:$0xff] }
  0x11   : > { %227 = vmatpush1.msra.mxu0 %v837_v3  ;;  %337 = vmatpush1.msra.mxu1 %v837_v3  ;;  %v995_v19 = vld [vmem:[%s1149_s1 + $0x80] sm:$0xff]  ;;  %v192_v20 = vld [vmem:[%s977_s26 + $0x8] sm:$0xff]  ;;  %v194_v24 = vld [vmem:[%s977_s26 + $0x18] sm:$0xff] }
  0x12   : > { %228 = vmatprep.subr.mxu0 %v789_v1  ;;  %338 = vmatprep.subr.mxu1 %v789_v1  ;;  %v191_v21 = vld [vmem:[%s977_s26] sm:$0xff]  ;;  %v730_v22 = vld [vmem:[%s977_s26 + $0x48] sm:$0xff]  ;;  %v193_v25 = vld [vmem:[%s977_s26 + $0x10] sm:$0xff] }
  0x13   : > { %229 = vmatpush1.msra.mxu0 %v846_v4  ;;  %339 = vmatpush1.msra.mxu1 %v846_v4  ;;  %v729_v23 = vld [vmem:[%s977_s26 + $0x40] sm:$0xff]  ;;  %v732_v26 = vld [vmem:[%s977_s26 + $0x58] sm:$0xff]  ;;  %v731_v27 = vld [vmem:[%s977_s26 + $0x50] sm:$0xff] }
  0x14   : > { %230 = vmatprep.subr.mxu0 %v789_v1  ;;  %340 = vmatprep.subr.mxu1 %v789_v1  ;;  %v196_v28 = vld [vmem:[%s977_s26 + $0x28] sm:$0xff]  ;;  %v195_v29 = vld [vmem:[%s977_s26 + $0x20] sm:$0xff]  ;;  %v198_v32 = vld [vmem:[%s977_s26 + $0x38] sm:$0x1] }
  0x15   : > { %231 = vmatpush1.msra.mxu0 %v855_v5  ;;  %341 = vmatpush1.msra.mxu1 %v855_v5  ;;  %v734_v30 = vld [vmem:[%s977_s26 + $0x68] sm:$0xff]  ;;  %v733_v31 = vld [vmem:[%s977_s26 + $0x60] sm:$0xff]  ;;  %v197_v33 = vld [vmem:[%s977_s26 + $0x30] sm:$0x1] }
  0x16   : > { %232 = vmatprep.subr.mxu0 %v789_v1  ;;  %342 = vmatprep.subr.mxu1 %v789_v1  ;;  %v736_v34 = vld [vmem:[%s977_s26 + $0x78] sm:$0x1]  ;;  %v735_v35 = vld [vmem:[%s977_s26 + $0x70] sm:$0x1]  ;;  %v743_v36 = vld [vmem:[%s977_s26 + $0x88] sm:$0xff] }
  0x17   : > { %233 = vmatpush1.msra.mxu0 %v864_v6  ;;  %343 = vmatpush1.msra.mxu1 %v864_v6  ;;  %v756_v37 = vld [vmem:[%s977_s26 + $0xc8] sm:$0xff]  ;;  %v742_v38 = vld [vmem:[%s977_s26 + $0x80] sm:$0xff]  ;;  %v745_v40 = vld [vmem:[%s977_s26 + $0x98] sm:$0xff] }
  0x18   : > { %234 = vmatprep.subr.mxu0 %v789_v1  ;;  %344 = vmatprep.subr.mxu1 %v789_v1  ;;  %v755_v39 = vld [vmem:[%s977_s26 + $0xc0] sm:$0xff]  ;;  %v758_v41 = vld [vmem:[%s977_s26 + $0xd8] sm:$0xff]  ;;  %v744_v42 = vld [vmem:[%s977_s26 + $0x90] sm:$0xff] }
  0x19   : > { %235 = vmatpush1.msra.mxu0 %v873_v7  ;;  %345 = vmatpush1.msra.mxu1 %v873_v7  ;;  %v757_v43 = vld [vmem:[%s977_s26 + $0xd0] sm:$0xff]  ;;  %v747_v44 = vld [vmem:[%s977_s26 + $0xa8] sm:$0xff]  ;;  %v746_v46 = vld [vmem:[%s977_s26 + $0xa0] sm:$0xff] }
  0x1a   : > { %236 = vmatprep.subr.mxu0 %v789_v1  ;;  %346 = vmatprep.subr.mxu1 %v789_v1  ;;  %v760_v45 = vld [vmem:[%s977_s26 + $0xe8] sm:$0xff]  ;;  %v759_v47 = vld [vmem:[%s977_s26 + $0xe0] sm:$0xff]  ;;  %v749_v48 = vld [vmem:[%s977_s26 + $0xb8] sm:$0x1] }
  0x1b   : > { %237 = vmatpush1.msra.mxu0 %v882_v8  ;;  %347 = vmatpush1.msra.mxu1 %v882_v8  ;;  %v762_v49 = vld [vmem:[%s977_s26 + $0xf8] sm:$0x1]  ;;  %v748_v50 = vld [vmem:[%s977_s26 + $0xb0] sm:$0x1] }
  0x1c   : > { %238 = vmatprep.subr.mxu0 %v789_v1  ;;  %348 = vmatprep.subr.mxu1 %v789_v1  ;;  %v761_v51 = vld [vmem:[%s977_s26 + $0xf0] sm:$0x1] }
  0x1d   : > { %239 = vmatpush1.msra.mxu0 %v891_v9  ;;  %349 = vmatpush1.msra.mxu1 %v891_v9 }
  0x1e   : > { %240 = vmatprep.subr.mxu0 %v789_v1  ;;  %350 = vmatprep.subr.mxu1 %v789_v1 }
  0x1f   : > { %241 = vmatpush1.msra.mxu0 %v900_v10  ;;  %351 = vmatpush1.msra.mxu1 %v900_v10 }
  0x20   : > { %242 = vmatprep.subr.mxu0 %v789_v1  ;;  %352 = vmatprep.subr.mxu1 %v789_v1 }
  0x21   : > { %243 = vmatpush1.msra.mxu0 %v909_v11  ;;  %353 = vmatpush1.msra.mxu1 %v909_v11 }
  0x22   : > { %244 = vmatprep.subr.mxu0 %v789_v1  ;;  %354 = vmatprep.subr.mxu1 %v789_v1 }
  0x23   : > { %245 = vmatpush1.msra.mxu0 %v918_v12  ;;  %355 = vmatpush1.msra.mxu1 %v918_v12 }
  0x24   : > { %246 = vmatprep.subr.mxu0 %v789_v1  ;;  %356 = vmatprep.subr.mxu1 %v789_v1 }
  0x25   : > { %247 = vmatpush1.msra.mxu0 %v929_v13  ;;  %357 = vmatpush1.msra.mxu1 %v929_v13 }
  0x26   : > { %248 = vmatprep.subr.mxu0 %v789_v1  ;;  %358 = vmatprep.subr.mxu1 %v789_v1 }
  0x27   : > { %249 = vmatpush1.msra.mxu0 %v938_v14  ;;  %359 = vmatpush1.msra.mxu1 %v938_v14 }
  0x28   : > { %250 = vmatprep.subr.mxu0 %v789_v1  ;;  %360 = vmatprep.subr.mxu1 %v789_v1 }
  0x29   : > { %251 = vmatpush1.msra.mxu0 %v951_v15  ;;  %361 = vmatpush1.msra.mxu1 %v951_v15 }
  0x2a   : > { %252 = vmatprep.subr.mxu0 %v789_v1  ;;  %362 = vmatprep.subr.mxu1 %v789_v1 }
  0x2b   : > { %253 = vmatpush1.msra.mxu0 %v960_v16  ;;  %363 = vmatpush1.msra.mxu1 %v960_v16 }
  0x2c   : > { %280 = vmatprep.subr.mxu0 %v789_v1  ;;  %390 = vmatprep.subr.mxu1 %v789_v1 }
  0x2d   : > { %724 = vmatpush2.msk.msra.mxu0 %vm218_vm0, %v970_v17  ;;  %737 = vmatpush2.msk.msra.mxu1 %vm218_vm0, %v970_v17 }
  0x2e   : > { %282 = vmatprep.subr.mxu0 %v789_v1  ;;  %392 = vmatprep.subr.mxu1 %v789_v1 }
  0x2f   : > { %283 = vmatpush2.msra.mxu0 %v984_v18  ;;  %393 = vmatpush2.msra.mxu1 %v984_v18 }
  0x30   : > { %284 = vmatprep.subr.mxu0 %v789_v1  ;;  %394 = vmatprep.subr.mxu1 %v789_v1 }
  0x31   : > { %285 = vmatpush2.msra.mxu0 %v995_v19  ;;  %725 = vmatprep.mubr.msk.f32.mxu0 %vm205_vm1, %v192_v20 }
  0x32   : > { %395 = vmatpush2.msra.mxu1 %v995_v19  ;;  %287 = vmatmul.mubr.f32.vlgmr.msra.gmra.mxu0 %v191_v21 }
  0x33   : > { %738 = vmatprep.mubr.msk.f32.mxu1 %vm205_vm1, %v730_v22  ;;  %446 = vmatprep.subr.mxu0 %v789_v1 }
  0x34   : > { %560 = vmatprep.subr.mxu1 %v789_v1  ;;  %397 = vmatmul.mubr.f32.vlgmr.msra.gmra.mxu1 %v729_v23 }
  0x35   : > { %447 = vmatpush1.msra.mxu0 %v821_v0  ;;  %561 = vmatpush1.msra.mxu1 %v821_v0 }
  0x36   : > { %448 = vmatprep.subr.mxu0 %v789_v1  ;;  %562 = vmatprep.subr.mxu1 %v789_v1 }
  0x37   : > { %449 = vmatpush1.msra.mxu0 %v828_v2  ;;  %563 = vmatpush1.msra.mxu1 %v828_v2 }
  0x38   : > { %450 = vmatprep.subr.mxu0 %v789_v1  ;;  %564 = vmatprep.subr.mxu1 %v789_v1 }
  0x39   : > { %451 = vmatpush1.msra.mxu0 %v837_v3  ;;  %565 = vmatpush1.msra.mxu1 %v837_v3 }
  0x3a   : > { %452 = vmatprep.subr.mxu0 %v789_v1  ;;  %566 = vmatprep.subr.mxu1 %v789_v1 }
  0x3b   : > { %453 = vmatpush1.msra.mxu0 %v846_v4  ;;  %567 = vmatpush1.msra.mxu1 %v846_v4 }
  0x3c   : > { %454 = vmatprep.subr.mxu0 %v789_v1  ;;  %568 = vmatprep.subr.mxu1 %v789_v1 }
  0x3d   : > { %455 = vmatpush1.msra.mxu0 %v855_v5  ;;  %569 = vmatpush1.msra.mxu1 %v855_v5 }
  0x3e   : > { %456 = vmatprep.subr.mxu0 %v789_v1  ;;  %570 = vmatprep.subr.mxu1 %v789_v1 }
  0x3f   : > { %457 = vmatpush1.msra.mxu0 %v864_v6  ;;  %571 = vmatpush1.msra.mxu1 %v864_v6 }
  0x40   : > { %458 = vmatprep.subr.mxu0 %v789_v1  ;;  %572 = vmatprep.subr.mxu1 %v789_v1 }
  0x41   : > { %459 = vmatpush1.msra.mxu0 %v873_v7  ;;  %573 = vmatpush1.msra.mxu1 %v873_v7 }
  0x42   : > { %460 = vmatprep.subr.mxu0 %v789_v1  ;;  %574 = vmatprep.subr.mxu1 %v789_v1 }
  0x43   : > { %461 = vmatpush1.msra.mxu0 %v882_v8  ;;  %575 = vmatpush1.msra.mxu1 %v882_v8 }
  0x44   : > { %462 = vmatprep.subr.mxu0 %v789_v1  ;;  %576 = vmatprep.subr.mxu1 %v789_v1 }
  0x45   : > { %463 = vmatpush1.msra.mxu0 %v891_v9  ;;  %577 = vmatpush1.msra.mxu1 %v891_v9 }
  0x46   : > { %464 = vmatprep.subr.mxu0 %v789_v1  ;;  %578 = vmatprep.subr.mxu1 %v789_v1 }
  0x47   : > { %465 = vmatpush1.msra.mxu0 %v900_v10  ;;  %579 = vmatpush1.msra.mxu1 %v900_v10 }
  0x48   : > { %466 = vmatprep.subr.mxu0 %v789_v1  ;;  %580 = vmatprep.subr.mxu1 %v789_v1 }
  0x49   : > { %467 = vmatpush1.msra.mxu0 %v909_v11  ;;  %581 = vmatpush1.msra.mxu1 %v909_v11 }
  0x4a   : > { %468 = vmatprep.subr.mxu0 %v789_v1  ;;  %582 = vmatprep.subr.mxu1 %v789_v1 }
  0x4b   : > { %726 = vmatprep.mubr.msk.f32.mxu0 %vm205_vm1, %v194_v24  ;;  %469 = vmatpush1.msra.mxu0 %v918_v12 }
  0x4c   : > { %583 = vmatpush1.msra.mxu1 %v918_v12  ;;  %292 = vmatmul.mubr.f32.gmra.mxu0 %v193_v25 }
  0x4d   : > { %470 = vmatprep.subr.mxu0 %v789_v1  ;;  %584 = vmatprep.subr.mxu1 %v789_v1 }
  0x4e   : > { %739 = vmatprep.mubr.msk.f32.mxu1 %vm205_vm1, %v732_v26  ;;  %471 = vmatpush1.msra.mxu0 %v929_v13 }
  0x4f   : > { %585 = vmatpush1.msra.mxu1 %v929_v13  ;;  %472 = vmatprep.subr.mxu0 %v789_v1 }
  0x50   : > { %402 = vmatmul.mubr.f32.gmra.mxu1 %v731_v27  ;;  %586 = vmatprep.subr.mxu1 %v789_v1 }
  0x51   : > { %727 = vmatprep.mubr.msk.f32.mxu0 %vm205_vm1, %v196_v28  ;;  %473 = vmatpush1.msra.mxu0 %v938_v14 }
  0x52   : > { %587 = vmatpush1.msra.mxu1 %v938_v14  ;;  %297 = vmatmul.mubr.f32.gmra.mxu0 %v195_v29 }
  0x53   : > { %474 = vmatprep.subr.mxu0 %v789_v1  ;;  %588 = vmatprep.subr.mxu1 %v789_v1 }
  0x54   : > { %740 = vmatprep.mubr.msk.f32.mxu1 %vm205_vm1, %v734_v30  ;;  %475 = vmatpush1.msra.mxu0 %v951_v15 }
  0x55   : > { %589 = vmatpush1.msra.mxu1 %v951_v15  ;;  %476 = vmatprep.subr.mxu0 %v789_v1 }
  0x56   : > { %407 = vmatmul.mubr.f32.gmra.mxu1 %v733_v31  ;;  %590 = vmatprep.subr.mxu1 %v789_v1 }
  0x57   : > { %728 = vmatprep.mubr.msk.f32.mxu0 %vm205_vm1, %v198_v32  ;;  %477 = vmatpush1.msra.mxu0 %v960_v16 }
  0x58   : > { %591 = vmatpush1.msra.mxu1 %v960_v16  ;;  %302 = vmatmul.mubr.f32.gmra.mxu0 %v197_v33 }
  0x59   : > { %504 = vmatprep.subr.mxu0 %v789_v1  ;;  %618 = vmatprep.subr.mxu1 %v789_v1 }
  0x5a   : > { %741 = vmatprep.mubr.msk.f32.mxu1 %vm205_vm1, %v736_v34  ;;  %750 = vmatpush2.msk.msra.mxu0 %vm218_vm0, %v970_v17 }
  0x5b   : > { %763 = vmatpush2.msk.msra.mxu1 %vm218_vm0, %v970_v17  ;;  %506 = vmatprep.subr.mxu0 %v789_v1 }
  0x5c   : > { %412 = vmatmul.mubr.f32.gmra.mxu1 %v735_v35  ;;  %620 = vmatprep.subr.mxu1 %v789_v1 }
  0x5d   : > { %507 = vmatpush2.msra.mxu0 %v984_v18  ;;  %621 = vmatpush2.msra.mxu1 %v984_v18 }
  0x5e   : > { %508 = vmatprep.subr.mxu0 %v789_v1  ;;  %622 = vmatprep.subr.mxu1 %v789_v1  ;;  %v723_v1 = vld [vmem:[%s1150_s2] ss:$0 sm:$0xff] }
  0x5f   : > { %509 = vmatpush2.msra.mxu0 %v995_v19  ;;  %751 = vmatprep.mubr.msk.f32.mxu0 %vm205_vm1, %v743_v36 }
  0x60   : > { %623 = vmatpush2.msra.mxu1 %v995_v19  ;;  %764 = vmatprep.mubr.msk.f32.mxu1 %vm205_vm1, %v756_v37 }
  0x61   : > { %511 = vmatmul.mubr.f32.vlgmr.msra.gmra.mxu0 %v742_v38  ;;  %625 = vmatmul.mubr.f32.vlgmr.msra.gmra.mxu1 %v755_v39 }
  0x62   : > { %752 = vmatprep.mubr.msk.f32.mxu0 %vm205_vm1, %v745_v40  ;;  %765 = vmatprep.mubr.msk.f32.mxu1 %vm205_vm1, %v758_v41 }
  0x65   : > { %516 = vmatmul.mubr.f32.gmra.mxu0 %v744_v42  ;;  %630 = vmatmul.mubr.f32.gmra.mxu1 %v757_v43 }
  0x66   : > { %753 = vmatprep.mubr.msk.f32.mxu0 %vm205_vm1, %v747_v44  ;;  %766 = vmatprep.mubr.msk.f32.mxu1 %vm205_vm1, %v760_v45 }
  0x69   : > { %521 = vmatmul.mubr.f32.gmra.mxu0 %v746_v46  ;;  %635 = vmatmul.mubr.f32.gmra.mxu1 %v759_v47 }
  0x6a   : > { %754 = vmatprep.mubr.msk.f32.mxu0 %vm205_vm1, %v749_v48  ;;  %767 = vmatprep.mubr.msk.f32.mxu1 %vm205_vm1, %v762_v49 }
  0x6d   : > { %526 = vmatmul.mubr.f32.gmra.mxu0 %v748_v50  ;;  %640 = vmatmul.mubr.f32.gmra.mxu1 %v761_v51 }
  0xf2   : > { %v288_v52 = vpop.f32.mrf.mxu0 }
  0xf3   : > { %v289_v3 = vadd.f32 %v723_v1, %v288_v52 }
  0xf4   : > { %v398_v53 = vpop.f32.mrf.mxu1  ;;  %v290_v54 = vpop.f32.mrf.mxu0 }
  0xf5   : > { %v399_v4 = vadd.f32 %v723_v1, %v398_v53  ;;  %v307_v9 = vmax.f32 %v289_v3, 0.0 }
  0xf6   : > { %v400_v55 = vpop.f32.mrf.mxu1 }
  0xf7   : > { %v417_v10 = vmax.f32 %v399_v4, 0.0 }
  0xf9   : > { %v421_v21 = vmax.f32 %v307_v9, %v417_v10 }
 0x10c   : > { %v293_v56 = vpop.f32.mrf.mxu0 }
 0x10d   : > { %v294_v7 = vadd.f32 %v723_v1, %v293_v56 }
 0x10e   : > { %v295_v57 = vpop.f32.mrf.mxu0 }
 0x10f   : > { %v308_v15 = vmax.f32 %v294_v7, 0.0 }
 0x110   : > { %v403_v58 = vpop.f32.mrf.mxu1 }
 0x111   : > { %v404_v8 = vadd.f32 %v723_v1, %v403_v58 }
 0x112   : > { %v298_v59 = vpop.f32.mrf.mxu0  ;;  %v405_v60 = vpop.f32.mrf.mxu1 }
 0x113   : > { %v418_v16 = vmax.f32 %v404_v8, 0.0  ;;  %v299_v17 = vadd.f32 %v723_v1, %v298_v59 }
 0x114   : > { %v300_v61 = vpop.f32.mrf.mxu0 }
 0x115   : > { %v422_v29 = vmax.f32 %v308_v15, %v418_v16  ;;  %v309_v30 = vmax.f32 %v299_v17, 0.0 }
 0x116   : > { %v408_v62 = vpop.f32.mrf.mxu1 }
 0x117   : > { %v409_v18 = vadd.f32 %v723_v1, %v408_v62 }
 0x118   : > { %v303_v63 = vpop.f32.mrf.mxu0  ;;  %v410_v0 = vpop.f32.mrf.mxu1 }
 0x119   : > { %v419_v31 = vmax.f32 %v409_v18, 0.0  ;;  %v304_v32 = vadd.f32 %v723_v1, %v303_v63 }
 0x11a   : > { %v305_v2 = vpop.f32.mrf.mxu0 }
 0x11b   : > { %v423_v44 = vmax.f32 %v309_v30, %v419_v31  ;;  %v310_v45 = vmax.f32 %v304_v32, 0.0 }
 0x11c   : > { %v413_v5 = vpop.f32.mrf.mxu1 }
 0x11d   : > { %v414_v35 = vadd.f32 %v723_v1, %v413_v5 }
 0x11e   : > { %v415_v6 = vpop.f32.mrf.mxu1 }
 0x11f   : > { %v420_v48 = vmax.f32 %v414_v35, 0.0 }
 0x121   : > { %v512_v11 = vpop.f32.mrf.mxu0  ;;  %v626_v12 = vpop.f32.mrf.mxu1  ;;  %v424_v59 = vmax.f32 %v310_v45, %v420_v48 }
 0x122   : > { %v513_v13 = vadd.f32 %v723_v1, %v512_v11  ;;  %v627_v14 = vadd.f32 %v723_v1, %v626_v12 }
 0x123   : > { %v514_v19 = vpop.f32.mrf.mxu0  ;;  %v628_v20 = vpop.f32.mrf.mxu1 }
 0x124   : > { %v531_v22 = vmax.f32 %v513_v13, 0.0  ;;  %v645_v23 = vmax.f32 %v627_v14, 0.0 }
 0x125   : > { %v517_v24 = vpop.f32.mrf.mxu0  ;;  %v631_v25 = vpop.f32.mrf.mxu1 }
 0x126   : > { %v535_v26 = vmax.f32 %v421_v21, %v531_v22  ;;  %v518_v27 = vadd.f32 %v723_v1, %v517_v24  ;;  %v632_v28 = vadd.f32 %v723_v1, %v631_v25 }
 0x127   : > { %v519_v33 = vpop.f32.mrf.mxu0  ;;  %v633_v34 = vpop.f32.mrf.mxu1 }
 0x128   : > { %v649_v36 = vmax.f32 %v535_v26, %v645_v23  ;;  %v532_v37 = vmax.f32 %v518_v27, 0.0  ;;  %v646_v38 = vmax.f32 %v632_v28, 0.0 }
 0x129   : > { %v522_v39 = vpop.f32.mrf.mxu0  ;;  %v636_v40 = vpop.f32.mrf.mxu1 }
 0x12a   : > { %654 = vst.msk [vmem:[%s1136_s9] sm:$0xff] %vm653_vm2, %v649_v36  ;;  %v536_v41 = vmax.f32 %v422_v29, %v532_v37  ;;  %v523_v42 = vadd.f32 %v723_v1, %v522_v39  ;;  %v637_v43 = vadd.f32 %v723_v1, %v636_v40 }
 0x12b   : > { %v524_v46 = vpop.f32.mrf.mxu0  ;;  %v638_v47 = vpop.f32.mrf.mxu1 }
 0x12c   : > { %v650_v49 = vmax.f32 %v536_v41, %v646_v38  ;;  %v533_v50 = vmax.f32 %v523_v42, 0.0  ;;  %v647_v51 = vmax.f32 %v637_v43, 0.0 }
 0x12d   : > { %v527_v52 = vpop.f32.mrf.mxu0  ;;  %v641_v53 = vpop.f32.mrf.mxu1 }
 0x12e   : > { %655 = vst.msk [vmem:[%s1136_s9 + $0x8] sm:$0xff] %vm653_vm2, %v650_v49  ;;  %v537_v54 = vmax.f32 %v423_v44, %v533_v50  ;;  %v528_v55 = vadd.f32 %v723_v1, %v527_v52  ;;  %v642_v56 = vadd.f32 %v723_v1, %v641_v53 }
 0x12f   : > { %v529_v57 = vpop.f32.mrf.mxu0  ;;  %v643_v58 = vpop.f32.mrf.mxu1 }
 0x130   : > { %v651_v60 = vmax.f32 %v537_v54, %v647_v51  ;;  %v534_v61 = vmax.f32 %v528_v55, 0.0  ;;  %v648_v62 = vmax.f32 %v642_v56, 0.0 }
 0x132   : > { %656 = vst.msk [vmem:[%s1136_s9 + $0x10] sm:$0xff] %vm653_vm2, %v651_v60  ;;  %v538_v63 = vmax.f32 %v424_v59, %v534_v61 }
 0x134   : > { %v652_v0 = vmax.f32 %v538_v63, %v648_v62 }
 0x136   : > { %658 = vst.msk [vmem:[%s1136_s9 + $0x18] sm:$0x1] %vm657_vm3, %v652_v0 }
 0x137 PF: > { %s13_s12 = sadd.s32 1, %s787_s12  }
 0x138   : > { %p10_p4 = scmp.ge.s32.totalorder %s13_s12, 4  }
 0x13a   :  { %12 = sbr.rel (!%p10_p4) target bundleno = 1 (0x1), region = 65 }

// kernel: net_forward.5
= control target key start
LH: loop header
LB: loop body
LE: loop exit
PB: predicated region body
PF: predicated region fallthrough
CT: control target
= control target key end

     0   :  { %v614_v3 = vmov 0.0   ;;  %v615_v23 = vmov 1983009808   ;;  %v90_v25 = vlaneseq  ;;  %s947_s0 = inlined_call_operand.vmem [shape: f32[2,400], index: 0, kind: input, shape index: {}]   ;;  %s948_s1 = inlined_call_operand.vmem [shape: f32[400,120], index: 1, kind: input, shape index: {}]   ;;  %s949_s2 = inlined_call_operand.vmem [shape: f32[1,120], index: 2, kind: input, shape index: {}]   ;;  %s950_s3 = inlined_call_operand.vmem [shape: f32[120,84], index: 3, kind: input, shape index: {}]   ;;  %s951_s4 = inlined_call_operand.vmem [shape: f32[1,84], index: 4, kind: input, shape index: {}]   ;;  %s952_s5 = inlined_call_operand.vmem [shape: f32[84,10], index: 5, kind: input, shape index: {}]   ;;  %s953_s6 = inlined_call_operand.vmem [shape: f32[1,10], index: 6, kind: input, shape index: {}]   ;;  %s954_s7 = inlined_call_operand.hbm [shape: f32[2,10], index: 7, kind: output, shape index: {}]  }
   0x1   :  { %v59_v0 = vld [vmem:[%s948_s1 + $0xf8] sm:$0xff]  ;;  %179 = vmatprep.subr.mxu1 %v614_v3  ;;  %v58_v4 = vld [vmem:[%s948_s1 + $0xf0] sm:$0xff]  ;;  %v57_v7 = vld [vmem:[%s948_s1 + $0xe8] sm:$0xff]  ;;  %v88_v24 = vunpack.c.l.s4 %v615_v23 }
   0x2   :  { %v43_v1 = vld [vmem:[%s948_s1 + $0x78] sm:$0xff]  ;;  %466 = vmatprep.subr.mxu0 %v59_v0  ;;  %v42_v5 = vld [vmem:[%s948_s1 + $0x70] sm:$0xff]  ;;  %v41_v8 = vld [vmem:[%s948_s1 + $0x68] sm:$0xff]  ;;  %v91_v33 = vshrl.u32 %v90_v25, 7 }
   0x3   :  { %v75_v2 = vld [vmem:[%s948_s1 + $0x178] sm:$0xff]  ;;  %v74_v6 = vld [vmem:[%s948_s1 + $0x170] sm:$0xff]  ;;  %467 = vmatpush3.msra.mxu0 %v43_v1  ;;  %v73_v9 = vld [vmem:[%s948_s1 + $0x168] sm:$0xff]  ;;  %v89_v32 = vunpack.c.0.s8 %v88_v24 }
   0x4   :  { %180 = vmatpush1.msra.mxu1 %v75_v2  ;;  %468 = vmatprep.subr.mxu0 %v58_v4  ;;  %v56_v10 = vld [vmem:[%s948_s1 + $0xe0] sm:$0xff]  ;;  %v55_v13 = vld [vmem:[%s948_s1 + $0xd8] sm:$0xff]  ;;  %v54_v16 = vld [vmem:[%s948_s1 + $0xd0] sm:$0xff] }
   0x5   :  { %181 = vmatprep.subr.mxu1 %v614_v3  ;;  %469 = vmatpush3.msra.mxu0 %v42_v5  ;;  %v40_v11 = vld [vmem:[%s948_s1 + $0x60] sm:$0xff]  ;;  %v39_v14 = vld [vmem:[%s948_s1 + $0x58] sm:$0xff]  ;;  %v38_v17 = vld [vmem:[%s948_s1 + $0x50] sm:$0xff]  ;;  %v92_v40 = vsub.s32 %v89_v32, %v91_v33 }
   0x6   :  { %182 = vmatpush1.msra.mxu1 %v74_v6  ;;  %470 = vmatprep.subr.mxu0 %v57_v7  ;;  %v72_v12 = vld [vmem:[%s948_s1 + $0x160] sm:$0xff]  ;;  %v71_v15 = vld [vmem:[%s948_s1 + $0x158] sm:$0xff]  ;;  %v70_v18 = vld [vmem:[%s948_s1 + $0x150] sm:$0xff] }
   0x7   :  { %183 = vmatprep.subr.mxu1 %v614_v3  ;;  %471 = vmatpush3.msra.mxu0 %v41_v8  ;;  %v53_v19 = vld [vmem:[%s948_s1 + $0xc8] sm:$0xff]  ;;  %v52_v22 = vld [vmem:[%s948_s1 + $0xc0] sm:$0xff]  ;;  %v51_v28 = vld [vmem:[%s948_s1 + $0xb8] sm:$0xff] }
   0x8   :  { %184 = vmatpush1.msra.mxu1 %v73_v9  ;;  %472 = vmatprep.subr.mxu0 %v56_v10  ;;  %v37_v20 = vld [vmem:[%s948_s1 + $0x48] sm:$0xff]  ;;  %v36_v26 = vld [vmem:[%s948_s1 + $0x40] sm:$0xff]  ;;  %v35_v29 = vld [vmem:[%s948_s1 + $0x38] sm:$0xff] }
   0x9   :  { %185 = vmatprep.subr.mxu1 %v614_v3  ;;  %473 = vmatpush3.msra.mxu0 %v40_v11  ;;  %v69_v21 = vld [vmem:[%s948_s1 + $0x148] sm:$0xff]  ;;  %v68_v27 = vld [vmem:[%s948_s1 + $0x140] sm:$0xff]  ;;  %v67_v30 = vld [vmem:[%s948_s1 + $0x138] sm:$0xff] }
   0xa   :  { %186 = vmatpush1.msra.mxu1 %v72_v12  ;;  %474 = vmatprep.subr.mxu0 %v55_v13  ;;  %v50_v31 = vld [vmem:[%s948_s1 + $0xb0] sm:$0xff]  ;;  %v49_v36 = vld [vmem:[%s948_s1 + $0xa8] sm:$0xff]  ;;  %v48_v39 = vld [vmem:[%s948_s1 + $0xa0] sm:$0xff] }
   0xb   :  { %187 = vmatprep.subr.mxu1 %v614_v3  ;;  %475 = vmatpush3.msra.mxu0 %v39_v14  ;;  %v34_v34 = vld [vmem:[%s948_s1 + $0x30] sm:$0xff]  ;;  %v33_v37 = vld [vmem:[%s948_s1 + $0x28] sm:$0xff] }
   0xc   :  { %188 = vmatpush1.msra.mxu1 %v71_v15  ;;  %476 = vmatprep.subr.mxu0 %v54_v16  ;;  %v66_v35 = vld [vmem:[%s948_s1 + $0x130] sm:$0xff]  ;;  %v65_v38 = vld [vmem:[%s948_s1 + $0x128] sm:$0xff] }
   0xd   :  { %189 = vmatprep.subr.mxu1 %v614_v3  ;;  %477 = vmatpush3.msra.mxu0 %v38_v17 }
   0xe   :  { %190 = vmatpush1.msra.mxu1 %v70_v18  ;;  %478 = vmatprep.subr.mxu0 %v53_v19 }
   0xf   :  { %191 = vmatprep.subr.mxu1 %v614_v3  ;;  %479 = vmatpush3.msra.mxu0 %v37_v20 }
  0x10   :  { %192 = vmatpush1.msra.mxu1 %v69_v21  ;;  %480 = vmatprep.subr.mxu0 %v52_v22 }
  0x11   :  { %193 = vmatprep.subr.mxu1 %v614_v3  ;;  %481 = vmatpush3.msra.mxu0 %v36_v26 }
  0x12   :  { %194 = vmatpush1.msra.mxu1 %v68_v27  ;;  %482 = vmatprep.subr.mxu0 %v51_v28 }
  0x13   :  { %195 = vmatprep.subr.mxu1 %v614_v3  ;;  %483 = vmatpush3.msra.mxu0 %v35_v29 }
  0x14   :  { %196 = vmatpush1.msra.mxu1 %v67_v30  ;;  %484 = vmatprep.subr.mxu0 %v50_v31 }
  0x15   :  { %197 = vmatprep.subr.mxu1 %v614_v3  ;;  %485 = vmatpush3.msra.mxu0 %v34_v34 }
  0x16   :  { %198 = vmatpush1.msra.mxu1 %v66_v35 }
  0x17   :  { %12 = vsyncpa [#allocation3], 0  ;;  %486 = vmatprep.subr.mxu0 %v49_v36  ;;  %199 = vmatprep.subr.mxu1 %v614_v3  ;;  %v32_v41 = vld [vmem:[%s948_s1 + $0x20] sm:$0xff]  ;;  %v47_v44 = vld [vmem:[%s948_s1 + $0x98] sm:$0xff]  ;;  %vm106_vm0 = vcmask 130048   ;;  %vm616_vm1 = vmmov 0  }
  0x18   :  { %v64_v42 = vld [vmem:[%s948_s1 + $0x120] sm:$0xff]  ;;  %487 = vmatpush3.msra.mxu0 %v33_v37  ;;  %200 = vmatpush1.msra.mxu1 %v65_v38  ;;  %v31_v46 = vld [vmem:[%s948_s1 + $0x18] sm:$0xff]  ;;  %v46_v48 = vld [vmem:[%s948_s1 + $0x90] sm:$0xff]  ;;  %vm369_vm2 = vcmask 1043456   ;;  %vm272_vm3 = vcmask 982016   ;;  %vm365_vm4 = vcmask 687104  }
  0x19   :  { %v27_v43 = vld [vmem:[%s947_s0] sm:$0xff]  ;;  %488 = vmatprep.subr.mxu0 %v48_v39  ;;  %201 = vmatprep.subr.mxu1 %v614_v3  ;;  %v63_v47 = vld [vmem:[%s948_s1 + $0x118] sm:$0xff]  ;;  %v30_v50 = vld [vmem:[%s948_s1 + $0x10] sm:$0xff]  ;;  %vm443_vm5 = vcmask 74752  }
  0x1a   :  { %v86_v45 = vcombine.high %v27_v43, %v27_v43  ;;  %489 = vmatpush3.msra.mxu0 %v32_v41  ;;  %202 = vmatpush1.msra.mxu1 %v64_v42  ;;  %v93_v49 = vrot.slane %v27_v43, %v92_v40  ;;  %v62_v51 = vld [vmem:[%s948_s1 + $0x110] sm:$0xff]  ;;  %v45_v52 = vld [vmem:[%s948_s1 + $0x88] sm:$0xff]  ;;  %v44_v56 = vld [vmem:[%s948_s1 + $0x80] sm:$0xff] }
  0x1b   :  { %490 = vmatprep.subr.mxu0 %v47_v44  ;;  %203 = vmatprep.subr.mxu1 %v614_v3  ;;  %v29_v54 = vld [vmem:[%s948_s1 + $0x8] sm:$0xff]  ;;  %v28_v58 = vld [vmem:[%s948_s1] sm:$0xff]  ;;  %v264_v62 = vld [vmem:[%s950_s3 + $0x70] sm:$0xff] }
  0x1c   :  { %491 = vmatpush3.msra.mxu0 %v31_v46  ;;  %204 = vmatpush1.msra.mxu1 %v63_v47  ;;  %v100_v53 = vrot.slane %v86_v45, %v92_v40  ;;  %v61_v55 = vld [vmem:[%s948_s1 + $0x108] sm:$0xff]  ;;  %v101_v57 = vcombine.high %v93_v49, %v93_v49  ;;  %v60_v59 = vld [vmem:[%s948_s1 + $0x100] sm:$0xff]  ;;  %v261_v2 = vld [vmem:[%s950_s3 + $0x58] sm:$0xff] }
  0x1d   :  { %492 = vmatprep.subr.mxu0 %v46_v48  ;;  %205 = vmatprep.subr.mxu1 %v614_v3  ;;  %v77_v61 = vld [vmem:[%s948_s1 + $0x188] sm:$0xff]  ;;  %v76_v63 = vld [vmem:[%s948_s1 + $0x180] sm:$0xff]  ;;  %v260_v4 = vld [vmem:[%s950_s3 + $0x50] sm:$0xff]  ;;  %s617_s1 = smov [#allocation2]  }
  0x1e   :  { %493 = vmatpush3.msra.mxu0 %v30_v50  ;;  %206 = vmatpush1.msra.mxu1 %v62_v51  ;;  %v102_v60 = vcombine.high %v100_v53, %v100_v53  ;;  %v263_v0 = vld [vmem:[%s950_s3 + $0x68] sm:$0xff]  ;;  %v262_v1 = vld [vmem:[%s950_s3 + $0x60] sm:$0xff]  ;;  %v257_v7 = vld [vmem:[%s950_s3 + $0x38] sm:$0xff]  ;;  %s451_s15 = sshll.u32 %s617_s1, 4  ;;  %s452_s15 = int_to_ptr.vmem [resolvable:$true] %s451_s15 }
  0x1f   :  { %494 = vmatprep.subr.mxu0 %v45_v52  ;;  %207 = vmatprep.subr.mxu1 %v614_v3  ;;  %v259_v5 = vld [vmem:[%s950_s3 + $0x48] sm:$0xff]  ;;  %v258_v6 = vld [vmem:[%s950_s3 + $0x40] sm:$0xff]  ;;  %v256_v8 = vld [vmem:[%s950_s3 + $0x30] sm:$0xff]  ;;  %p597_p1 = scmp.lt.s32.totalorder %s452_s15, %s452_s15 }
  0x20   :  { %495 = vmatpush3.msra.mxu0 %v29_v54  ;;  %208 = vmatpush1.msra.mxu1 %v61_v55  ;;  %v255_v9 = vld [vmem:[%s950_s3 + $0x28] sm:$0xff]  ;;  %v254_v10 = vld [vmem:[%s950_s3 + $0x20] sm:$0xff]  ;;  %v253_v11 = vld [vmem:[%s950_s3 + $0x18] sm:$0xff] }
  0x21   :  { %496 = vmatprep.subr.mxu0 %v44_v56  ;;  %209 = vmatprep.subr.mxu1 %v614_v3  ;;  %v252_v12 = vld [vmem:[%s950_s3 + $0x10] sm:$0xff]  ;;  %v251_v13 = vld [vmem:[%s950_s3 + $0x8] sm:$0xff]  ;;  %v250_v14 = vld [vmem:[%s950_s3] sm:$0xff] }
  0x22   :  { %497 = vmatpush3.msra.mxu0 %v28_v58  ;;  %173 = vmatprep.mubr.f32.mxu0 %v101_v57  ;;  %v357_v15 = vld [vmem:[%s952_s5 + $0x50] sm:$0xf]  ;;  %v356_v16 = vld [vmem:[%s952_s5 + $0x48] sm:$0xff]  ;;  %v355_v17 = vld [vmem:[%s952_s5 + $0x40] sm:$0xff] }
  0x23   :  { %210 = vmatpush1.msra.mxu1 %v60_v59  ;;  %174 = vmatmul.mubr.f32.vlgmr.msra.gmra.mxu0 %v93_v49  ;;  %v354_v18 = vld [vmem:[%s952_s5 + $0x38] sm:$0xff]  ;;  %v353_v19 = vld [vmem:[%s952_s5 + $0x30] sm:$0xff]  ;;  %v352_v20 = vld [vmem:[%s952_s5 + $0x28] sm:$0xff] }
  0x24   :  { %239 = vmatprep.subr.mxu1 %v614_v3  ;;  %460 = vmatprep.mubr.msk.f32.mxu1 %vm106_vm0, %v102_v60  ;;  %v351_v21 = vld [vmem:[%s952_s5 + $0x20] sm:$0xff]  ;;  %v350_v22 = vld [vmem:[%s952_s5 + $0x18] sm:$0xff]  ;;  %v349_v32 = vld [vmem:[%s952_s5 + $0x10] sm:$0xff] }
  0x25   :  { %240 = vmatpush2.msra.mxu1 %v77_v61  ;;  %529 = vmatprep.subr.mxu0 %v614_v3  ;;  %v459_v25 = vld [vmem:[%s949_s2] ss:$0 sm:$0xff]  ;;  %v348_v33 = vld [vmem:[%s952_s5 + $0x8] sm:$0xff] }
  0x26   :  { %241 = vmatprep.subr.mxu1 %v614_v3  ;;  %530 = vmatpush3.msra.mxu0 %v264_v62  ;;  %v347_v34 = vld [vmem:[%s952_s5] sm:$0xff]  ;;  %s592_s5 = scalar_lea.vmem %s452_s15, 32 }
  0x27   :  { %242 = vmatpush2.msra.mxu1 %v76_v63  ;;  %531 = vmatprep.subr.mxu0 %v614_v3  ;;  %v461_v35 = vld [vmem:[%s951_s4] ss:$0 sm:$0xff]  ;;  %p593_p0 = scmp.ne.s32.totalorder %s452_s15, %s592_s5  ;;  %p598_p2 = scmp.lt.s32.totalorder %s592_s5, %s592_s5 }
  0x28   :  { %244 = vmatmul.mubr.f32.vlgmr.msra.gmra.mxu1 %v100_v53  ;;  %532 = vmatpush3.msra.mxu0 %v263_v0  ;;  %v463_v40 = vld [vmem:[%s953_s6] ss:$0 sm:$0xff] }
  0x29   :  { %533 = vmatprep.subr.mxu0 %v614_v3  ;;  %562 = vmatprep.subr.mxu1 %v614_v3  ;;  %p599_p3 = por %p598_p2, %p597_p1 }
  0x2a   :  { %534 = vmatpush3.msra.mxu0 %v262_v1  ;;  %559 = vmatprep.mubr.msk.f32.mxu0 %vm616_vm1, %v614_v3 }
  0x2b   :  { %535 = vmatprep.subr.mxu0 %v614_v3  ;;  %584 = vmatprep.mubr.msk.f32.mxu1 %vm616_vm1, %v614_v3  ;;  %p600_p4 = pnand %p599_p3, %p593_p0 }
  0x2c   :  { %536 = vmatpush3.msra.mxu0 %v261_v2  ;;  %563 = vmatpush3.msk.msra.mxu1 %vm369_vm2, %v357_v15 }
  0x2d   :  { %537 = vmatprep.subr.mxu0 %v614_v3  ;;  %564 = vmatprep.subr.mxu1 %v614_v3 }
  0x2e   :  { %538 = vmatpush3.msra.mxu0 %v260_v4  ;;  %565 = vmatpush3.msra.mxu1 %v356_v16 }
  0x2f   :  { %539 = vmatprep.subr.mxu0 %v614_v3  ;;  %566 = vmatprep.subr.mxu1 %v614_v3 }
  0x30   :  { %540 = vmatpush3.msra.mxu0 %v259_v5  ;;  %567 = vmatpush3.msra.mxu1 %v355_v17 }
  0x31   :  { %541 = vmatprep.subr.mxu0 %v614_v3  ;;  %568 = vmatprep.subr.mxu1 %v614_v3 }
  0x32   :  { %542 = vmatpush3.msra.mxu0 %v258_v6  ;;  %569 = vmatpush3.msra.mxu1 %v354_v18 }
  0x33   :  { %543 = vmatprep.subr.mxu0 %v614_v3  ;;  %570 = vmatprep.subr.mxu1 %v614_v3 }
  0x34   :  { %544 = vmatpush3.msra.mxu0 %v257_v7  ;;  %571 = vmatpush3.msra.mxu1 %v353_v19 }
  0x35   :  { %545 = vmatprep.subr.mxu0 %v614_v3  ;;  %572 = vmatprep.subr.mxu1 %v614_v3 }
  0x36   :  { %546 = vmatpush3.msra.mxu0 %v256_v8  ;;  %573 = vmatpush3.msra.mxu1 %v352_v20 }
  0x37   :  { %547 = vmatprep.subr.mxu0 %v614_v3  ;;  %574 = vmatprep.subr.mxu1 %v614_v3 }
  0x38   :  { %548 = vmatpush3.msra.mxu0 %v255_v9  ;;  %575 = vmatpush3.msra.mxu1 %v351_v21 }
  0x39   :  { %549 = vmatprep.subr.mxu0 %v614_v3  ;;  %576 = vmatprep.subr.mxu1 %v614_v3 }
  0x3a   :  { %550 = vmatpush3.msra.mxu0 %v254_v10  ;;  %577 = vmatpush3.msra.mxu1 %v350_v22 }
  0x3b   :  { %551 = vmatprep.subr.mxu0 %v614_v3  ;;  %578 = vmatprep.subr.mxu1 %v614_v3 }
  0x3c   :  { %552 = vmatpush3.msra.mxu0 %v253_v11  ;;  %579 = vmatpush3.msra.mxu1 %v349_v32 }
  0x3d   :  { %553 = vmatprep.subr.mxu0 %v614_v3  ;;  %580 = vmatprep.subr.mxu1 %v614_v3 }
  0x3e   :  { %554 = vmatpush3.msra.mxu0 %v252_v12  ;;  %581 = vmatpush3.msra.mxu1 %v348_v33 }
  0x3f   :  { %555 = vmatprep.subr.mxu0 %v614_v3  ;;  %582 = vmatprep.subr.mxu1 %v614_v3 }
  0x40   :  { %556 = vmatpush3.msra.mxu0 %v251_v13  ;;  %583 = vmatpush3.msra.mxu1 %v347_v34 }
  0x41   :  { %557 = vmatprep.subr.mxu0 %v614_v3 }
  0x42   :  { %558 = vmatpush3.msra.mxu0 %v250_v14 }
  0xe3   :  { %v498_v23 = vpop.f32.mrf.mxu0 }
  0xe5   :  { %v499_v24 = vpop.f32.mrf.mxu0 }
  0xe6   :  { %v500_v26 = vadd.f32 %v499_v24, %v498_v23 }
  0xe8   :  { %v176_v27 = vadd.f32 %v500_v26, %v459_v25  ;;  %v245_v28 = vpop.f32.mrf.mxu1 }
  0xea   :  { %v246_v29 = vadd.f32 %v245_v28, %v176_v27  ;;  %v247_v30 = vpop.f32.mrf.mxu1 }
  0xec   :  { %v249_v31 = vmax.f32 %v246_v29, 0.0 }
  0xee   :  { %560 = vmatmul.mubr.msk.f32.vlgmr.msra.gmra.mxu0 %vm272_vm3, %v249_v31 }
 0x1ae   :  { %v342_v36 = vpop.f32.mrf.mxu0 }
 0x1af   :  { %v343_v37 = vadd.f32 %v461_v35, %v342_v36 }
 0x1b0   :  { %v561_v38 = vpop.f32.mrf.mxu0 }
 0x1b1   :  { %v346_v39 = vmax.f32 %v343_v37, 0.0 }
 0x1b3   :  { %585 = vmatmul.mubr.msk.f32.vlgmr.msra.gmra.mxu1 %vm365_vm4, %v346_v39 }
 0x273   :  { %v439_v41 = vpop.f32.mrf.mxu1 }
 0x274   :  { %v440_v3 = vadd.f32 %v463_v40, %v439_v41 }
 0x275   :  { %v586_v42 = vpop.f32.mrf.mxu1 }
 0x276   :  { %444 = vst.msk [vmem:[#allocation2] sm:$0x3] %vm443_vm5, %v440_v3 }
 0x277   :  { %603 = shalt.err (!%p600_p4)
}
 0x278   :  { %454 = dma.vmem_to_hbm [thread:$0]  %s452_s15, 32, %s954_s7, [#allocation3]  }
 0x279   :  { %612 = dma.done.wait [#allocation3], 32  }
 0x27a   :  { %613 = vsyncadd [#allocation3], 4294967264 }
 0x27b   :  { %458 = vsyncpa [#allocation3], 1 }

</bundles_post_ra>
